<compile_context>
chip_gen: v7x
topology: tpu7x:2x2x1
jax: 0.10.0
libtpu: 0.0.40
codegen_flags: <defaults>
</compile_context>

<pallas_src>
import functools

import jax
import jax.numpy as jnp
from jax.experimental import pallas as pl
from jax.experimental.pallas import tpu as pltpu

_LANE = 128
_VMEM_BUDGET = 12 << 20          # conservative per-tile working set (all gens)
_VMEM_LIMIT = 32 << 20           # scoped VMEM limit hint (<= physical on v5e/v6e/v7x)


# ------------------------------ Pallas kernel -------------------------------

def _bottleneck_kernel(x_ref, valid_ref, w1_ref, vm_ref, w3_ref, v3_ref, o_ref,
                       *, wp, tm, residual):
    """Fused MobileNetV2 gumbel bottleneck on one padded lane-dense tile.

    x_ref:     (cin, TM)   bf16  padded channel-major activation (zero border)
    valid_ref: (1,   TM)   f32   1 at interior pixels, 0 at padding/tail
    w1_ref:    (mid, cin)  bf16  1x1 expansion weights
    vm_ref:    (15, mid,1) f32   [s1,b1,m1, s2,b2,m2, w2_tap0..w2_tap8]
    w3_ref:    (out, mid)  bf16  1x1 projection weights
    v3_ref:    (2, out, 1) f32   [s3*mask_out, b3*mask_out]
    o_ref:     (out, TM)   bf16  output, same padded layout (zero border)
    """
    x = x_ref[...]                       # (cin, TM) bf16
    valid = valid_ref[...]               # (1, TM)   f32
    vm = vm_ref[...]                     # (15, mid, 1) f32
    v3 = v3_ref[...]                     # (2, out, 1)  f32

    # conv1 (1x1) + BN1 + relu6 + gumbel mid-channel mask, then re-zero the
    # padded border so `h` equals the zero-padded input of the depthwise conv.
    h = jnp.dot(w1_ref[...], x, preferred_element_type=jnp.float32)
    h = jnp.minimum(jnp.maximum(h * vm[0] + vm[1], 0.0), 6.0)
    h = h * vm[2] * valid

    # 3x3 depthwise conv: 9 uniform shifts along the flat (n, r, c) lane axis.
    # Tap (kh, kw) reads h at flat offset (kh-1)*Wp + (kw-1); wrap-around only
    # touches border/pad positions, which are zeroed again at the end.
    acc = vm[10] * h                     # center tap (kh=1, kw=1), offset 0
    for kh in range(3):
        for kw in range(3):
            if kh == 1 and kw == 1:
                continue
            delta = (kh - 1) * wp + (kw - 1)
            acc = acc + vm[6 + kh * 3 + kw] * pltpu.roll(h, (-delta) % tm, 1)

    # BN2 + relu6 + gumbel mid-channel mask.
    d = jnp.minimum(jnp.maximum(acc * vm[3] + vm[4], 0.0), 6.0) * vm[5]

    # conv3 (1x1) + BN3 with the out-channel gumbel mask folded in.
    y = jnp.dot(w3_ref[...], d.astype(jnp.bfloat16),
                preferred_element_type=jnp.float32)
    y = y * v3[0] + v3[1]
    y = y * valid                        # zero border -> next block's padding
    if residual:
        y = y + x.astype(jnp.float32)
    o_ref[...] = y.astype(jnp.bfloat16)


def fused_bottleneck(xflat, valid, w1, vm, w3, v3, *, wp, tm, residual):
    cin, total = xflat.shape
    mid = vm.shape[1]
    out_c = v3.shape[1]
    ntiles = total // tm

    kernel = functools.partial(_bottleneck_kernel, wp=wp, tm=tm,
                               residual=residual)
    return pl.pallas_call(
        kernel,
        grid=(ntiles,),
        in_specs=[
            pl.BlockSpec((cin, tm), lambda i: (0, i)),
            pl.BlockSpec((1, tm), lambda i: (0, i)),
            pl.BlockSpec((mid, cin), lambda i: (0, 0)),
            pl.BlockSpec((15, mid, 1), lambda i: (0, 0, 0)),
            pl.BlockSpec((out_c, mid), lambda i: (0, 0)),
            pl.BlockSpec((2, out_c, 1), lambda i: (0, 0, 0)),
        ],
        out_specs=pl.BlockSpec((out_c, tm), lambda i: (0, i)),
        out_shape=jax.ShapeDtypeStruct((out_c, total), jnp.bfloat16),
        compiler_params=pltpu.CompilerParams(
            dimension_semantics=("parallel",),
            vmem_limit_bytes=_VMEM_LIMIT),
    )(xflat, valid, w1, vm, w3, v3)


# -------------------------------- JAX glue ----------------------------------

def _pick_tile(n, hpwp, cin, mid, out_c):
    """Choose images-per-tile / padded lane-tile under a VMEM working-set
    budget (counting in-kernel intermediates); keep >=2 grid programs when
    n >= 2 so both v7x TensorCores are used."""
    def tile(ipt):
        tm = -(-ipt * hpwp // _LANE) * _LANE
        per_lane = (2 * 2 * cin          # bf16 input, double buffered
                    + 2 * 4              # f32 valid row, double buffered
                    + 2 * 2 * out_c      # bf16 output, double buffered
                    + 16 * mid)          # f32 intermediates (h, roll, acc, tmp)
        return tm, tm * per_lane
    ipt_best, tm_best = 1, tile(1)[0]
    for ipt in range(2, n + 1):
        if n % ipt or n // ipt < min(2, n):
            continue
        tm, nbytes = tile(ipt)
        if nbytes <= _VMEM_BUDGET:
            ipt_best, tm_best = ipt, tm
    return ipt_best, tm_best


def _pack(x_cmajor_padded, ipt, tm):
    """(C, N, Hp, Wp) -> (C, ntiles*tm) padded lane-dense layout."""
    c, n, hp, wp = x_cmajor_padded.shape
    ntiles = n // ipt
    raw = ipt * hp * wp
    xr = x_cmajor_padded.reshape(c, ntiles, raw)
    if tm > raw:
        xr = jnp.pad(xr, ((0, 0), (0, 0), (0, tm - raw)))
    return xr.reshape(c, ntiles * tm)


def _unpack(yflat, n, hp, wp, ipt, tm):
    """(C, ntiles*tm) -> (C, N, Hp, Wp)."""
    c = yflat.shape[0]
    ntiles = n // ipt
    raw = ipt * hp * wp
    return yflat.reshape(c, ntiles, tm)[:, :, :raw].reshape(c, n, hp, wp)


def channel_mask(c, thresholds, gw):
    """sum_i gw[i] * [ones(thresh_i), zeros(c - thresh_i)] -> (c,) vector."""
    idx = jnp.arange(c)
    m = jnp.zeros((c,), jnp.float32)
    for i, t in enumerate(thresholds):
        m = m + gw[i] * (idx < t).astype(jnp.float32)
    return m


def stage_gumbel_forward(x_nchw, params, gw, *, channel_options, ef,
                         first_stride, out_c):
    n, c0, h, w = x_nchw.shape
    x = x_nchw.astype(jnp.float32)
    cin_max = max(c0, out_c)
    mid_max = cin_max * ef

    def make_layout(hh, ww):
        hp, wp = hh + 2, ww + 2
        ipt, tm = _pick_tile(n, hp * wp, cin_max, mid_max, out_c)
        ones = jnp.ones((1, n, hh, ww), jnp.float32)
        vflat = _pack(jnp.pad(ones, ((0, 0), (0, 0), (1, 1), (1, 1))), ipt, tm)
        return dict(h=hh, w=ww, hp=hp, wp=wp, ipt=ipt, tm=tm, valid=vflat)

    # Stage entry: single layout conversion NCHW -> padded channel-major flat.
    lay = make_layout(h, w)
    xflat = _pack(jnp.pad(jnp.transpose(x, (1, 0, 2, 3)),
                          ((0, 0), (0, 0), (1, 1), (1, 1))),
                  lay["ipt"], lay["tm"]).astype(jnp.bfloat16)

    for b, p in enumerate(params):
        stride = first_stride if b == 0 else 1
        cin = xflat.shape[0]
        mid = cin * ef
        m1 = channel_mask(mid, [co * ef for co in channel_options], gw)
        mout = channel_mask(out_c, channel_options, gw)
        vm = jnp.stack([p["s1"], p["b1"], m1, p["s2"], p["b2"], m1]
                       + [p["w2"][k] for k in range(9)], 0)[:, :, None]
        v3 = jnp.stack([p["s3"] * mout, p["b3"] * mout], 0)[:, :, None]
        residual = (stride == 1 and cin == out_c)

        yflat = fused_bottleneck(
            xflat, lay["valid"],
            p["w1"].astype(jnp.bfloat16), vm,
            p["w3"].astype(jnp.bfloat16), v3,
            wp=lay["wp"], tm=lay["tm"], residual=residual)

        if stride == 1:
            # Output is already in the next block's padded lane-dense layout.
            xflat = yflat
        else:
            # Strided block: subsample the full-resolution output and re-pad.
            y4 = _unpack(yflat, n, lay["hp"], lay["wp"], lay["ipt"], lay["tm"])
            ho = (lay["h"] - 1) // stride + 1
            wo = (lay["w"] - 1) // stride + 1
            ysub = y4[:, :, 1:1 + stride * ho:stride, 1:1 + stride * wo:stride]
            lay = make_layout(ho, wo)
            xflat = _pack(jnp.pad(ysub, ((0, 0), (0, 0), (1, 1), (1, 1))),
                          lay["ipt"], lay["tm"])

    # Stage exit: single layout conversion back to NCHW.
    y4 = _unpack(xflat, n, lay["hp"], lay["wp"], lay["ipt"], lay["tm"])
    y = jnp.transpose(y4[:, :, 1:-1, 1:-1], (1, 0, 2, 3)).astype(jnp.float32)
    expected_outch = jnp.sum(gw * jnp.asarray(channel_options, jnp.float32))
    return y, expected_outch


# -------------------------- pure-JAX reference ------------------------------

def stage_reference(x, params, gw, *, channel_options, ef, first_stride, out_c):
    hi = jax.lax.Precision.HIGHEST
    for b, p in enumerate(params):
        stride = first_stride if b == 0 else 1
        cin = x.shape[1]
        mid = cin * ef
        m1 = channel_mask(mid, [c * ef for c in channel_options], gw)
        mo = channel_mask(out_c, channel_options, gw)
        m = jnp.einsum("oc,nchw->nohw", p["w1"], x, precision=hi)
        m = jnp.clip(m * p["s1"][None, :, None, None]
                     + p["b1"][None, :, None, None], 0.0, 6.0)
        m = m * m1[None, :, None, None]
        w2 = p["w2"].reshape(3, 3, mid).transpose(2, 0, 1)[:, None]
        d = jax.lax.conv_general_dilated(
            m, w2, (stride, stride), ((1, 1), (1, 1)),
            dimension_numbers=("NCHW", "OIHW", "NCHW"),
            feature_group_count=mid, precision=hi)
        d = jnp.clip(d * p["s2"][None, :, None, None]
                     + p["b2"][None, :, None, None], 0.0, 6.0)
        d = d * m1[None, :, None, None]
        y = jnp.einsum("oc,nchw->nohw", p["w3"], d, precision=hi)
        y = y * p["s3"][None, :, None, None] + p["b3"][None, :, None, None]
        y = y * mo[None, :, None, None]
        if stride == 1 and cin == out_c:
            y = y + x
        x = y
    return x


# -------------------------- deterministic params ----------------------------

def fold_bn(gamma, beta, mean, var, eps=1e-5):
    scale = gamma / jnp.sqrt(var + eps)
    bias = beta - mean * scale
    return scale.astype(jnp.float32), bias.astype(jnp.float32)


def init_bn(key, c):
    k1, k2, k3, k4 = jax.random.split(key, 4)
    gamma = jax.random.uniform(k1, (c,), jnp.float32, 0.5, 1.5)
    beta = jax.random.normal(k2, (c,), jnp.float32) * 0.1
    mean = jax.random.normal(k3, (c,), jnp.float32) * 0.1
    var = jax.random.uniform(k4, (c,), jnp.float32, 0.5, 1.5)
    return fold_bn(gamma, beta, mean, var)


def init_bottleneck(key, in_c, out_c, ef):
    mid = in_c * ef
    ks = jax.random.split(key, 6)
    w1 = jax.random.normal(ks[0], (mid, in_c), jnp.float32) / jnp.sqrt(float(in_c))
    s1, b1 = init_bn(ks[1], mid)
    w2 = jax.random.normal(ks[2], (9, mid), jnp.float32) / 3.0
    s2, b2 = init_bn(ks[3], mid)
    w3 = jax.random.normal(ks[4], (out_c, mid), jnp.float32) / jnp.sqrt(float(mid))
    s3, b3 = init_bn(ks[5], out_c)
    return dict(w1=w1, s1=s1, b1=b1, w2=w2, s2=s2, b2=b2, w3=w3, s3=s3, b3=b3)


# ----------------------------------- main ------------------------------------

if __name__ == "__main__":
    in_channels = 8
    out_channels = 8
    expand_factor = 2
    num_blocks = 2
    first_stride = 2
    channel_options = [4, 6, 8]

    key = jax.random.PRNGKey(0)
    k_x, k_p = jax.random.split(key)
    x = jax.random.normal(k_x, (2, in_channels, 16, 16), jnp.float32)  # NCHW

    gumbel_weights = jnp.full((len(channel_options),),
                              1.0 / len(channel_options), jnp.float32)
    params = []
    block_keys = jax.random.split(k_p, num_blocks)
    for b in range(num_blocks):
        in_c = in_channels if b == 0 else out_channels
        params.append(init_bottleneck(block_keys[b], in_c, out_channels,
                                      expand_factor))

    fwd = jax.jit(functools.partial(
        stage_gumbel_forward,
        channel_options=channel_options,
        ef=expand_factor,
        first_stride=first_stride,
        out_c=out_channels))

    y, expected_outch = fwd(x, params, gumbel_weights)
    jax.block_until_ready((y, expected_outch))

    # Pure-JAX f32 reference check (loose tolerance: kernel streams bf16).
    y_ref = stage_reference(x, params, gumbel_weights,
                            channel_options=channel_options, ef=expand_factor,
                            first_stride=first_stride, out_c=out_channels)
    err = float(jnp.max(jnp.abs(y - y_ref)))
    scale = float(jnp.max(jnp.abs(y_ref)))

    assert y.shape == (2, out_channels, 16 // first_stride, 16 // first_stride)
    assert bool(jnp.all(jnp.isfinite(y)))
    assert bool(jnp.isfinite(expected_outch))
    assert err <= 0.05 * scale + 0.25, f"mismatch: {err:.4f} (scale {scale:.4f})"
    print("KERNEL_OK")
</pallas_src>

<mosaic_0001>
module attributes {stable_mosaic.version = 11 : i64} {
  func.func @_bottleneck_kernel(%arg0: i32, %arg1: memref<8x384xbf16, #tpu.memory_space<vmem>>, %arg2: memref<1x384xf32, #tpu.memory_space<vmem>>, %arg3: memref<16x8xbf16, #tpu.memory_space<vmem>>, %arg4: memref<15x16x1xf32, #tpu.memory_space<vmem>>, %arg5: memref<8x16xbf16, #tpu.memory_space<vmem>>, %arg6: memref<2x8x1xf32, #tpu.memory_space<vmem>>, %arg7: memref<8x384xbf16, #tpu.memory_space<vmem>>) attributes {dimension_semantics = [#tpu.dimension_semantics<parallel>], iteration_bounds = array<i64: 2>, scalar_prefetch = 0 : i64, scratch_operands = 0 : i64, tpu.core_type = #tpu.core_type<tc>, window_params = [{transform_indices = @transform_0, window_bounds = array<i64: 8, 384>}, {transform_indices = @transform_1, window_bounds = array<i64: 1, 384>}, {pipeline_mode = #tpu.pipeline_mode<synchronous>, transform_indices = @transform_2, window_bounds = array<i64: 16, 8>}, {pipeline_mode = #tpu.pipeline_mode<synchronous>, transform_indices = @transform_3, window_bounds = array<i64: 15, 16, 1>}, {pipeline_mode = #tpu.pipeline_mode<synchronous>, transform_indices = @transform_4, window_bounds = array<i64: 8, 16>}, {pipeline_mode = #tpu.pipeline_mode<synchronous>, transform_indices = @transform_5, window_bounds = array<i64: 2, 8, 1>}, {transform_indices = @transform_6, window_bounds = array<i64: 8, 384>}]} {
    %c0 = arith.constant 0 : index
    %c0_0 = arith.constant 0 : index
    %0 = vector.load %arg1[%c0, %c0_0] : memref<8x384xbf16, #tpu.memory_space<vmem>>, vector<8x384xbf16>
    %c0_1 = arith.constant 0 : index
    %c0_2 = arith.constant 0 : index
    %1 = vector.load %arg2[%c0_1, %c0_2] : memref<1x384xf32, #tpu.memory_space<vmem>>, vector<1x384xf32>
    %c0_3 = arith.constant 0 : index
    %c0_4 = arith.constant 0 : index
    %c0_5 = arith.constant 0 : index
    %2 = vector.load %arg4[%c0_3, %c0_4, %c0_5] : memref<15x16x1xf32, #tpu.memory_space<vmem>>, vector<15x16x1xf32>
    %c0_6 = arith.constant 0 : index
    %c0_7 = arith.constant 0 : index
    %c0_8 = arith.constant 0 : index
    %3 = vector.load %arg6[%c0_6, %c0_7, %c0_8] : memref<2x8x1xf32, #tpu.memory_space<vmem>>, vector<2x8x1xf32>
    %c0_9 = arith.constant 0 : index
    %c0_10 = arith.constant 0 : index
    %4 = vector.load %arg3[%c0_9, %c0_10] : memref<16x8xbf16, #tpu.memory_space<vmem>>, vector<16x8xbf16>
    %cst = arith.constant dense<0.000000e+00> : vector<16x384xf32>
    %5 = tpu.matmul %4, %0, %cst {dimension_numbers = #tpu.dot_dimension_numbers<[1], [0], [0], [1], [0, 0, 1, 1], [], []>} : vector<16x8xbf16>, vector<8x384xbf16>, vector<16x384xf32> -> vector<16x384xf32>
    %6 = vector.extract_strided_slice %2 {offsets = [0, 0, 0], sizes = [1, 16, 1], strides = [1, 1, 1]} : vector<15x16x1xf32> to vector<1x16x1xf32>
    %7 = vector.shape_cast %6 : vector<1x16x1xf32> to vector<16x1xf32>
    %8 = vector.broadcast %7 : vector<16x1xf32> to vector<16x384xf32>
    %9 = arith.mulf %5, %8 : vector<16x384xf32>
    %10 = vector.extract_strided_slice %2 {offsets = [1, 0, 0], sizes = [1, 16, 1], strides = [1, 1, 1]} : vector<15x16x1xf32> to vector<1x16x1xf32>
    %11 = vector.shape_cast %10 : vector<1x16x1xf32> to vector<16x1xf32>
    %12 = vector.broadcast %11 : vector<16x1xf32> to vector<16x384xf32>
    %13 = arith.addf %9, %12 : vector<16x384xf32>
    %cst_11 = arith.constant 0.000000e+00 : f32
    %14 = vector.broadcast %cst_11 : f32 to vector<16x384xf32>
    %15 = arith.maximumf %13, %14 : vector<16x384xf32>
    %cst_12 = arith.constant 6.000000e+00 : f32
    %16 = vector.broadcast %cst_12 : f32 to vector<16x384xf32>
    %17 = arith.minimumf %15, %16 : vector<16x384xf32>
    %18 = vector.extract_strided_slice %2 {offsets = [2, 0, 0], sizes = [1, 16, 1], strides = [1, 1, 1]} : vector<15x16x1xf32> to vector<1x16x1xf32>
    %19 = vector.shape_cast %18 : vector<1x16x1xf32> to vector<16x1xf32>
    %20 = vector.broadcast %19 : vector<16x1xf32> to vector<16x384xf32>
    %21 = arith.mulf %17, %20 : vector<16x384xf32>
    %22 = vector.broadcast %1 : vector<1x384xf32> to vector<16x384xf32>
    %23 = arith.mulf %21, %22 : vector<16x384xf32>
    %24 = vector.extract_strided_slice %2 {offsets = [10, 0, 0], sizes = [1, 16, 1], strides = [1, 1, 1]} : vector<15x16x1xf32> to vector<1x16x1xf32>
    %25 = vector.shape_cast %24 : vector<1x16x1xf32> to vector<16x1xf32>
    %26 = vector.broadcast %25 : vector<16x1xf32> to vector<16x384xf32>
    %27 = arith.mulf %26, %23 : vector<16x384xf32>
    %28 = vector.extract_strided_slice %2 {offsets = [6, 0, 0], sizes = [1, 16, 1], strides = [1, 1, 1]} : vector<15x16x1xf32> to vector<1x16x1xf32>
    %29 = vector.shape_cast %28 : vector<1x16x1xf32> to vector<16x1xf32>
    %c19_i32 = arith.constant 19 : i32
    %30 = tpu.dynamic_rotate %23 by %c19_i32 dim 1 : vector<16x384xf32>, i32 -> vector<16x384xf32>
    %31 = vector.broadcast %29 : vector<16x1xf32> to vector<16x384xf32>
    %32 = arith.mulf %31, %30 : vector<16x384xf32>
    %33 = arith.addf %27, %32 : vector<16x384xf32>
    %34 = vector.extract_strided_slice %2 {offsets = [7, 0, 0], sizes = [1, 16, 1], strides = [1, 1, 1]} : vector<15x16x1xf32> to vector<1x16x1xf32>
    %35 = vector.shape_cast %34 : vector<1x16x1xf32> to vector<16x1xf32>
    %c18_i32 = arith.constant 18 : i32
    %36 = tpu.dynamic_rotate %23 by %c18_i32 dim 1 : vector<16x384xf32>, i32 -> vector<16x384xf32>
    %37 = vector.broadcast %35 : vector<16x1xf32> to vector<16x384xf32>
    %38 = arith.mulf %37, %36 : vector<16x384xf32>
    %39 = arith.addf %33, %38 : vector<16x384xf32>
    %40 = vector.extract_strided_slice %2 {offsets = [8, 0, 0], sizes = [1, 16, 1], strides = [1, 1, 1]} : vector<15x16x1xf32> to vector<1x16x1xf32>
    %41 = vector.shape_cast %40 : vector<1x16x1xf32> to vector<16x1xf32>
    %c17_i32 = arith.constant 17 : i32
    %42 = tpu.dynamic_rotate %23 by %c17_i32 dim 1 : vector<16x384xf32>, i32 -> vector<16x384xf32>
    %43 = vector.broadcast %41 : vector<16x1xf32> to vector<16x384xf32>
    %44 = arith.mulf %43, %42 : vector<16x384xf32>
    %45 = arith.addf %39, %44 : vector<16x384xf32>
    %46 = vector.extract_strided_slice %2 {offsets = [9, 0, 0], sizes = [1, 16, 1], strides = [1, 1, 1]} : vector<15x16x1xf32> to vector<1x16x1xf32>
    %47 = vector.shape_cast %46 : vector<1x16x1xf32> to vector<16x1xf32>
    %c1_i32 = arith.constant 1 : i32
    %48 = tpu.dynamic_rotate %23 by %c1_i32 dim 1 : vector<16x384xf32>, i32 -> vector<16x384xf32>
    %49 = vector.broadcast %47 : vector<16x1xf32> to vector<16x384xf32>
    %50 = arith.mulf %49, %48 : vector<16x384xf32>
    %51 = arith.addf %45, %50 : vector<16x384xf32>
    %52 = vector.extract_strided_slice %2 {offsets = [11, 0, 0], sizes = [1, 16, 1], strides = [1, 1, 1]} : vector<15x16x1xf32> to vector<1x16x1xf32>
    %53 = vector.shape_cast %52 : vector<1x16x1xf32> to vector<16x1xf32>
    %c383_i32 = arith.constant 383 : i32
    %54 = tpu.dynamic_rotate %23 by %c383_i32 dim 1 : vector<16x384xf32>, i32 -> vector<16x384xf32>
    %55 = vector.broadcast %53 : vector<16x1xf32> to vector<16x384xf32>
    %56 = arith.mulf %55, %54 : vector<16x384xf32>
    %57 = arith.addf %51, %56 : vector<16x384xf32>
    %58 = vector.extract_strided_slice %2 {offsets = [12, 0, 0], sizes = [1, 16, 1], strides = [1, 1, 1]} : vector<15x16x1xf32> to vector<1x16x1xf32>
    %59 = vector.shape_cast %58 : vector<1x16x1xf32> to vector<16x1xf32>
    %c367_i32 = arith.constant 367 : i32
    %60 = tpu.dynamic_rotate %23 by %c367_i32 dim 1 : vector<16x384xf32>, i32 -> vector<16x384xf32>
    %61 = vector.broadcast %59 : vector<16x1xf32> to vector<16x384xf32>
    %62 = arith.mulf %61, %60 : vector<16x384xf32>
    %63 = arith.addf %57, %62 : vector<16x384xf32>
    %64 = vector.extract_strided_slice %2 {offsets = [13, 0, 0], sizes = [1, 16, 1], strides = [1, 1, 1]} : vector<15x16x1xf32> to vector<1x16x1xf32>
    %65 = vector.shape_cast %64 : vector<1x16x1xf32> to vector<16x1xf32>
    %c366_i32 = arith.constant 366 : i32
    %66 = tpu.dynamic_rotate %23 by %c366_i32 dim 1 : vector<16x384xf32>, i32 -> vector<16x384xf32>
    %67 = vector.broadcast %65 : vector<16x1xf32> to vector<16x384xf32>
    %68 = arith.mulf %67, %66 : vector<16x384xf32>
    %69 = arith.addf %63, %68 : vector<16x384xf32>
    %70 = vector.extract_strided_slice %2 {offsets = [14, 0, 0], sizes = [1, 16, 1], strides = [1, 1, 1]} : vector<15x16x1xf32> to vector<1x16x1xf32>
    %71 = vector.shape_cast %70 : vector<1x16x1xf32> to vector<16x1xf32>
    %c365_i32 = arith.constant 365 : i32
    %72 = tpu.dynamic_rotate %23 by %c365_i32 dim 1 : vector<16x384xf32>, i32 -> vector<16x384xf32>
    %73 = vector.broadcast %71 : vector<16x1xf32> to vector<16x384xf32>
    %74 = arith.mulf %73, %72 : vector<16x384xf32>
    %75 = arith.addf %69, %74 : vector<16x384xf32>
    %76 = vector.extract_strided_slice %2 {offsets = [3, 0, 0], sizes = [1, 16, 1], strides = [1, 1, 1]} : vector<15x16x1xf32> to vector<1x16x1xf32>
    %77 = vector.shape_cast %76 : vector<1x16x1xf32> to vector<16x1xf32>
    %78 = vector.broadcast %77 : vector<16x1xf32> to vector<16x384xf32>
    %79 = arith.mulf %75, %78 : vector<16x384xf32>
    %80 = vector.extract_strided_slice %2 {offsets = [4, 0, 0], sizes = [1, 16, 1], strides = [1, 1, 1]} : vector<15x16x1xf32> to vector<1x16x1xf32>
    %81 = vector.shape_cast %80 : vector<1x16x1xf32> to vector<16x1xf32>
    %82 = vector.broadcast %81 : vector<16x1xf32> to vector<16x384xf32>
    %83 = arith.addf %79, %82 : vector<16x384xf32>
    %cst_13 = arith.constant 0.000000e+00 : f32
    %84 = vector.broadcast %cst_13 : f32 to vector<16x384xf32>
    %85 = arith.maximumf %83, %84 : vector<16x384xf32>
    %cst_14 = arith.constant 6.000000e+00 : f32
    %86 = vector.broadcast %cst_14 : f32 to vector<16x384xf32>
    %87 = arith.minimumf %85, %86 : vector<16x384xf32>
    %88 = vector.extract_strided_slice %2 {offsets = [5, 0, 0], sizes = [1, 16, 1], strides = [1, 1, 1]} : vector<15x16x1xf32> to vector<1x16x1xf32>
    %89 = vector.shape_cast %88 : vector<1x16x1xf32> to vector<16x1xf32>
    %90 = vector.broadcast %89 : vector<16x1xf32> to vector<16x384xf32>
    %91 = arith.mulf %87, %90 : vector<16x384xf32>
    %c0_15 = arith.constant 0 : index
    %c0_16 = arith.constant 0 : index
    %92 = vector.load %arg5[%c0_15, %c0_16] : memref<8x16xbf16, #tpu.memory_space<vmem>>, vector<8x16xbf16>
    %93 = arith.truncf %91 : vector<16x384xf32> to vector<16x384xbf16>
    %cst_17 = arith.constant dense<0.000000e+00> : vector<8x384xf32>
    %94 = tpu.matmul %92, %93, %cst_17 {dimension_numbers = #tpu.dot_dimension_numbers<[1], [0], [0], [1], [0, 0, 1, 1], [], []>} : vector<8x16xbf16>, vector<16x384xbf16>, vector<8x384xf32> -> vector<8x384xf32>
    %95 = vector.extract_strided_slice %3 {offsets = [0, 0, 0], sizes = [1, 8, 1], strides = [1, 1, 1]} : vector<2x8x1xf32> to vector<1x8x1xf32>
    %96 = vector.shape_cast %95 : vector<1x8x1xf32> to vector<8x1xf32>
    %97 = vector.broadcast %96 : vector<8x1xf32> to vector<8x384xf32>
    %98 = arith.mulf %94, %97 : vector<8x384xf32>
    %99 = vector.extract_strided_slice %3 {offsets = [1, 0, 0], sizes = [1, 8, 1], strides = [1, 1, 1]} : vector<2x8x1xf32> to vector<1x8x1xf32>
    %100 = vector.shape_cast %99 : vector<1x8x1xf32> to vector<8x1xf32>
    %101 = vector.broadcast %100 : vector<8x1xf32> to vector<8x384xf32>
    %102 = arith.addf %98, %101 : vector<8x384xf32>
    %103 = vector.broadcast %1 : vector<1x384xf32> to vector<8x384xf32>
    %104 = arith.mulf %102, %103 : vector<8x384xf32>
    %105 = arith.truncf %104 : vector<8x384xf32> to vector<8x384xbf16>
    %c0_18 = arith.constant 0 : index
    %c0_19 = arith.constant 0 : index
    %106 = vector.load %arg7[%c0_18, %c0_19] : memref<8x384xbf16, #tpu.memory_space<vmem>>, vector<8x384xbf16>
    tpu.vector_store %arg7[%c0_18, %c0_19], %105 {strides = array<i32>} : memref<8x384xbf16, #tpu.memory_space<vmem>>, vector<8x384xbf16>,
    return
  }
  func.func @transform_0(%arg0: i32) -> (i32, i32) {
    %c0_i32 = arith.constant 0 : i32
    %c0_i32_0 = arith.constant 0 : i32
    return %c0_i32, %arg0 : i32, i32
  }
  func.func @transform_1(%arg0: i32) -> (i32, i32) {
    %c0_i32 = arith.constant 0 : i32
    %c0_i32_0 = arith.constant 0 : i32
    return %c0_i32, %arg0 : i32, i32
  }
  func.func @transform_2(%arg0: i32) -> (i32, i32) {
    %c0_i32 = arith.constant 0 : i32
    %c0_i32_0 = arith.constant 0 : i32
    %c0_i32_1 = arith.constant 0 : i32
    return %c0_i32, %c0_i32_0 : i32, i32
  }
  func.func @transform_3(%arg0: i32) -> (i32, i32, i32) {
    %c0_i32 = arith.constant 0 : i32
    %c0_i32_0 = arith.constant 0 : i32
    %c0_i32_1 = arith.constant 0 : i32
    %c0_i32_2 = arith.constant 0 : i32
    return %c0_i32, %c0_i32_0, %c0_i32_1 : i32, i32, i32
  }
  func.func @transform_4(%arg0: i32) -> (i32, i32) {
    %c0_i32 = arith.constant 0 : i32
    %c0_i32_0 = arith.constant 0 : i32
    %c0_i32_1 = arith.constant 0 : i32
    return %c0_i32, %c0_i32_0 : i32, i32
  }
  func.func @transform_5(%arg0: i32) -> (i32, i32, i32) {
    %c0_i32 = arith.constant 0 : i32
    %c0_i32_0 = arith.constant 0 : i32
    %c0_i32_1 = arith.constant 0 : i32
    %c0_i32_2 = arith.constant 0 : i32
    return %c0_i32, %c0_i32_0, %c0_i32_1 : i32, i32, i32
  }
  func.func @transform_6(%arg0: i32) -> (i32, i32) {
    %c0_i32 = arith.constant 0 : i32
    %c0_i32_0 = arith.constant 0 : i32
    return %c0_i32, %arg0 : i32, i32
  }
}

module attributes {stable_mosaic.version = 11 : i64} {
  func.func @_bottleneck_kernel(%arg0: i32, %arg1: memref<8x128xbf16, #tpu.memory_space<vmem>>, %arg2: memref<1x128xf32, #tpu.memory_space<vmem>>, %arg3: memref<16x8xbf16, #tpu.memory_space<vmem>>, %arg4: memref<15x16x1xf32, #tpu.memory_space<vmem>>, %arg5: memref<8x16xbf16, #tpu.memory_space<vmem>>, %arg6: memref<2x8x1xf32, #tpu.memory_space<vmem>>, %arg7: memref<8x128xbf16, #tpu.memory_space<vmem>>) attributes {dimension_semantics = [#tpu.dimension_semantics<parallel>], iteration_bounds = array<i64: 2>, scalar_prefetch = 0 : i64, scratch_operands = 0 : i64, tpu.core_type = #tpu.core_type<tc>, window_params = [{transform_indices = @transform_0, window_bounds = array<i64: 8, 128>}, {transform_indices = @transform_1, window_bounds = array<i64: 1, 128>}, {pipeline_mode = #tpu.pipeline_mode<synchronous>, transform_indices = @transform_2, window_bounds = array<i64: 16, 8>}, {pipeline_mode = #tpu.pipeline_mode<synchronous>, transform_indices = @transform_3, window_bounds = array<i64: 15, 16, 1>}, {pipeline_mode = #tpu.pipeline_mode<synchronous>, transform_indices = @transform_4, window_bounds = array<i64: 8, 16>}, {pipeline_mode = #tpu.pipeline_mode<synchronous>, transform_indices = @transform_5, window_bounds = array<i64: 2, 8, 1>}, {transform_indices = @transform_6, window_bounds = array<i64: 8, 128>}]} {
    %c0 = arith.constant 0 : index
    %c0_0 = arith.constant 0 : index
    %0 = vector.load %arg1[%c0, %c0_0] : memref<8x128xbf16, #tpu.memory_space<vmem>>, vector<8x128xbf16>
    %c0_1 = arith.constant 0 : index
    %c0_2 = arith.constant 0 : index
    %1 = vector.load %arg2[%c0_1, %c0_2] : memref<1x128xf32, #tpu.memory_space<vmem>>, vector<1x128xf32>
    %c0_3 = arith.constant 0 : index
    %c0_4 = arith.constant 0 : index
    %c0_5 = arith.constant 0 : index
    %2 = vector.load %arg4[%c0_3, %c0_4, %c0_5] : memref<15x16x1xf32, #tpu.memory_space<vmem>>, vector<15x16x1xf32>
    %c0_6 = arith.constant 0 : index
    %c0_7 = arith.constant 0 : index
    %c0_8 = arith.constant 0 : index
    %3 = vector.load %arg6[%c0_6, %c0_7, %c0_8] : memref<2x8x1xf32, #tpu.memory_space<vmem>>, vector<2x8x1xf32>
    %c0_9 = arith.constant 0 : index
    %c0_10 = arith.constant 0 : index
    %4 = vector.load %arg3[%c0_9, %c0_10] : memref<16x8xbf16, #tpu.memory_space<vmem>>, vector<16x8xbf16>
    %cst = arith.constant dense<0.000000e+00> : vector<16x128xf32>
    %5 = tpu.matmul %4, %0, %cst {dimension_numbers = #tpu.dot_dimension_numbers<[1], [0], [0], [1], [0, 0, 1, 1], [], []>} : vector<16x8xbf16>, vector<8x128xbf16>, vector<16x128xf32> -> vector<16x128xf32>
    %6 = vector.extract_strided_slice %2 {offsets = [0, 0, 0], sizes = [1, 16, 1], strides = [1, 1, 1]} : vector<15x16x1xf32> to vector<1x16x1xf32>
    %7 = vector.shape_cast %6 : vector<1x16x1xf32> to vector<16x1xf32>
    %8 = vector.broadcast %7 : vector<16x1xf32> to vector<16x128xf32>
    %9 = arith.mulf %5, %8 : vector<16x128xf32>
    %10 = vector.extract_strided_slice %2 {offsets = [1, 0, 0], sizes = [1, 16, 1], strides = [1, 1, 1]} : vector<15x16x1xf32> to vector<1x16x1xf32>
    %11 = vector.shape_cast %10 : vector<1x16x1xf32> to vector<16x1xf32>
    %12 = vector.broadcast %11 : vector<16x1xf32> to vector<16x128xf32>
    %13 = arith.addf %9, %12 : vector<16x128xf32>
    %cst_11 = arith.constant 0.000000e+00 : f32
    %14 = vector.broadcast %cst_11 : f32 to vector<16x128xf32>
    %15 = arith.maximumf %13, %14 : vector<16x128xf32>
    %cst_12 = arith.constant 6.000000e+00 : f32
    %16 = vector.broadcast %cst_12 : f32 to vector<16x128xf32>
    %17 = arith.minimumf %15, %16 : vector<16x128xf32>
    %18 = vector.extract_strided_slice %2 {offsets = [2, 0, 0], sizes = [1, 16, 1], strides = [1, 1, 1]} : vector<15x16x1xf32> to vector<1x16x1xf32>
    %19 = vector.shape_cast %18 : vector<1x16x1xf32> to vector<16x1xf32>
    %20 = vector.broadcast %19 : vector<16x1xf32> to vector<16x128xf32>
    %21 = arith.mulf %17, %20 : vector<16x128xf32>
    %22 = vector.broadcast %1 : vector<1x128xf32> to vector<16x128xf32>
    %23 = arith.mulf %21, %22 : vector<16x128xf32>
    %24 = vector.extract_strided_slice %2 {offsets = [10, 0, 0], sizes = [1, 16, 1], strides = [1, 1, 1]} : vector<15x16x1xf32> to vector<1x16x1xf32>
    %25 = vector.shape_cast %24 : vector<1x16x1xf32> to vector<16x1xf32>
    %26 = vector.broadcast %25 : vector<16x1xf32> to vector<16x128xf32>
    %27 = arith.mulf %26, %23 : vector<16x128xf32>
    %28 = vector.extract_strided_slice %2 {offsets = [6, 0, 0], sizes = [1, 16, 1], strides = [1, 1, 1]} : vector<15x16x1xf32> to vector<1x16x1xf32>
    %29 = vector.shape_cast %28 : vector<1x16x1xf32> to vector<16x1xf32>
    %c11_i32 = arith.constant 11 : i32
    %30 = tpu.dynamic_rotate %23 by %c11_i32 dim 1 : vector<16x128xf32>, i32 -> vector<16x128xf32>
    %31 = vector.broadcast %29 : vector<16x1xf32> to vector<16x128xf32>
    %32 = arith.mulf %31, %30 : vector<16x128xf32>
    %33 = arith.addf %27, %32 : vector<16x128xf32>
    %34 = vector.extract_strided_slice %2 {offsets = [7, 0, 0], sizes = [1, 16, 1], strides = [1, 1, 1]} : vector<15x16x1xf32> to vector<1x16x1xf32>
    %35 = vector.shape_cast %34 : vector<1x16x1xf32> to vector<16x1xf32>
    %c10_i32 = arith.constant 10 : i32
    %36 = tpu.dynamic_rotate %23 by %c10_i32 dim 1 : vector<16x128xf32>, i32 -> vector<16x128xf32>
    %37 = vector.broadcast %35 : vector<16x1xf32> to vector<16x128xf32>
    %38 = arith.mulf %37, %36 : vector<16x128xf32>
    %39 = arith.addf %33, %38 : vector<16x128xf32>
    %40 = vector.extract_strided_slice %2 {offsets = [8, 0, 0], sizes = [1, 16, 1], strides = [1, 1, 1]} : vector<15x16x1xf32> to vector<1x16x1xf32>
    %41 = vector.shape_cast %40 : vector<1x16x1xf32> to vector<16x1xf32>
    %c9_i32 = arith.constant 9 : i32
    %42 = tpu.dynamic_rotate %23 by %c9_i32 dim 1 : vector<16x128xf32>, i32 -> vector<16x128xf32>
    %43 = vector.broadcast %41 : vector<16x1xf32> to vector<16x128xf32>
    %44 = arith.mulf %43, %42 : vector<16x128xf32>
    %45 = arith.addf %39, %44 : vector<16x128xf32>
    %46 = vector.extract_strided_slice %2 {offsets = [9, 0, 0], sizes = [1, 16, 1], strides = [1, 1, 1]} : vector<15x16x1xf32> to vector<1x16x1xf32>
    %47 = vector.shape_cast %46 : vector<1x16x1xf32> to vector<16x1xf32>
    %c1_i32 = arith.constant 1 : i32
    %48 = tpu.dynamic_rotate %23 by %c1_i32 dim 1 : vector<16x128xf32>, i32 -> vector<16x128xf32>
    %49 = vector.broadcast %47 : vector<16x1xf32> to vector<16x128xf32>
    %50 = arith.mulf %49, %48 : vector<16x128xf32>
    %51 = arith.addf %45, %50 : vector<16x128xf32>
    %52 = vector.extract_strided_slice %2 {offsets = [11, 0, 0], sizes = [1, 16, 1], strides = [1, 1, 1]} : vector<15x16x1xf32> to vector<1x16x1xf32>
    %53 = vector.shape_cast %52 : vector<1x16x1xf32> to vector<16x1xf32>
    %c127_i32 = arith.constant 127 : i32
    %54 = tpu.dynamic_rotate %23 by %c127_i32 dim 1 : vector<16x128xf32>, i32 -> vector<16x128xf32>
    %55 = vector.broadcast %53 : vector<16x1xf32> to vector<16x128xf32>
    %56 = arith.mulf %55, %54 : vector<16x128xf32>
    %57 = arith.addf %51, %56 : vector<16x128xf32>
    %58 = vector.extract_strided_slice %2 {offsets = [12, 0, 0], sizes = [1, 16, 1], strides = [1, 1, 1]} : vector<15x16x1xf32> to vector<1x16x1xf32>
    %59 = vector.shape_cast %58 : vector<1x16x1xf32> to vector<16x1xf32>
    %c119_i32 = arith.constant 119 : i32
    %60 = tpu.dynamic_rotate %23 by %c119_i32 dim 1 : vector<16x128xf32>, i32 -> vector<16x128xf32>
    %61 = vector.broadcast %59 : vector<16x1xf32> to vector<16x128xf32>
    %62 = arith.mulf %61, %60 : vector<16x128xf32>
    %63 = arith.addf %57, %62 : vector<16x128xf32>
    %64 = vector.extract_strided_slice %2 {offsets = [13, 0, 0], sizes = [1, 16, 1], strides = [1, 1, 1]} : vector<15x16x1xf32> to vector<1x16x1xf32>
    %65 = vector.shape_cast %64 : vector<1x16x1xf32> to vector<16x1xf32>
    %c118_i32 = arith.constant 118 : i32
    %66 = tpu.dynamic_rotate %23 by %c118_i32 dim 1 : vector<16x128xf32>, i32 -> vector<16x128xf32>
    %67 = vector.broadcast %65 : vector<16x1xf32> to vector<16x128xf32>
    %68 = arith.mulf %67, %66 : vector<16x128xf32>
    %69 = arith.addf %63, %68 : vector<16x128xf32>
    %70 = vector.extract_strided_slice %2 {offsets = [14, 0, 0], sizes = [1, 16, 1], strides = [1, 1, 1]} : vector<15x16x1xf32> to vector<1x16x1xf32>
    %71 = vector.shape_cast %70 : vector<1x16x1xf32> to vector<16x1xf32>
    %c117_i32 = arith.constant 117 : i32
    %72 = tpu.dynamic_rotate %23 by %c117_i32 dim 1 : vector<16x128xf32>, i32 -> vector<16x128xf32>
    %73 = vector.broadcast %71 : vector<16x1xf32> to vector<16x128xf32>
    %74 = arith.mulf %73, %72 : vector<16x128xf32>
    %75 = arith.addf %69, %74 : vector<16x128xf32>
    %76 = vector.extract_strided_slice %2 {offsets = [3, 0, 0], sizes = [1, 16, 1], strides = [1, 1, 1]} : vector<15x16x1xf32> to vector<1x16x1xf32>
    %77 = vector.shape_cast %76 : vector<1x16x1xf32> to vector<16x1xf32>
    %78 = vector.broadcast %77 : vector<16x1xf32> to vector<16x128xf32>
    %79 = arith.mulf %75, %78 : vector<16x128xf32>
    %80 = vector.extract_strided_slice %2 {offsets = [4, 0, 0], sizes = [1, 16, 1], strides = [1, 1, 1]} : vector<15x16x1xf32> to vector<1x16x1xf32>
    %81 = vector.shape_cast %80 : vector<1x16x1xf32> to vector<16x1xf32>
    %82 = vector.broadcast %81 : vector<16x1xf32> to vector<16x128xf32>
    %83 = arith.addf %79, %82 : vector<16x128xf32>
    %cst_13 = arith.constant 0.000000e+00 : f32
    %84 = vector.broadcast %cst_13 : f32 to vector<16x128xf32>
    %85 = arith.maximumf %83, %84 : vector<16x128xf32>
    %cst_14 = arith.constant 6.000000e+00 : f32
    %86 = vector.broadcast %cst_14 : f32 to vector<16x128xf32>
    %87 = arith.minimumf %85, %86 : vector<16x128xf32>
    %88 = vector.extract_strided_slice %2 {offsets = [5, 0, 0], sizes = [1, 16, 1], strides = [1, 1, 1]} : vector<15x16x1xf32> to vector<1x16x1xf32>
    %89 = vector.shape_cast %88 : vector<1x16x1xf32> to vector<16x1xf32>
    %90 = vector.broadcast %89 : vector<16x1xf32> to vector<16x128xf32>
    %91 = arith.mulf %87, %90 : vector<16x128xf32>
    %c0_15 = arith.constant 0 : index
    %c0_16 = arith.constant 0 : index
    %92 = vector.load %arg5[%c0_15, %c0_16] : memref<8x16xbf16, #tpu.memory_space<vmem>>, vector<8x16xbf16>
    %93 = arith.truncf %91 : vector<16x128xf32> to vector<16x128xbf16>
    %cst_17 = arith.constant dense<0.000000e+00> : vector<8x128xf32>
    %94 = tpu.matmul %92, %93, %cst_17 {dimension_numbers = #tpu.dot_dimension_numbers<[1], [0], [0], [1], [0, 0, 1, 1], [], []>} : vector<8x16xbf16>, vector<16x128xbf16>, vector<8x128xf32> -> vector<8x128xf32>
    %95 = vector.extract_strided_slice %3 {offsets = [0, 0, 0], sizes = [1, 8, 1], strides = [1, 1, 1]} : vector<2x8x1xf32> to vector<1x8x1xf32>
    %96 = vector.shape_cast %95 : vector<1x8x1xf32> to vector<8x1xf32>
    %97 = vector.broadcast %96 : vector<8x1xf32> to vector<8x128xf32>
    %98 = arith.mulf %94, %97 : vector<8x128xf32>
    %99 = vector.extract_strided_slice %3 {offsets = [1, 0, 0], sizes = [1, 8, 1], strides = [1, 1, 1]} : vector<2x8x1xf32> to vector<1x8x1xf32>
    %100 = vector.shape_cast %99 : vector<1x8x1xf32> to vector<8x1xf32>
    %101 = vector.broadcast %100 : vector<8x1xf32> to vector<8x128xf32>
    %102 = arith.addf %98, %101 : vector<8x128xf32>
    %103 = vector.broadcast %1 : vector<1x128xf32> to vector<8x128xf32>
    %104 = arith.mulf %102, %103 : vector<8x128xf32>
    %105 = arith.extf %0 : vector<8x128xbf16> to vector<8x128xf32>
    %106 = arith.addf %104, %105 : vector<8x128xf32>
    %107 = arith.truncf %106 : vector<8x128xf32> to vector<8x128xbf16>
    %c0_18 = arith.constant 0 : index
    %c0_19 = arith.constant 0 : index
    %108 = vector.load %arg7[%c0_18, %c0_19] : memref<8x128xbf16, #tpu.memory_space<vmem>>, vector<8x128xbf16>
    tpu.vector_store %arg7[%c0_18, %c0_19], %107 {strides = array<i32>} : memref<8x128xbf16, #tpu.memory_space<vmem>>, vector<8x128xbf16>,
    return
  }
  func.func @transform_0(%arg0: i32) -> (i32, i32) {
    %c0_i32 = arith.constant 0 : i32
    %c0_i32_0 = arith.constant 0 : i32
    return %c0_i32, %arg0 : i32, i32
  }
  func.func @transform_1(%arg0: i32) -> (i32, i32) {
    %c0_i32 = arith.constant 0 : i32
    %c0_i32_0 = arith.constant 0 : i32
    return %c0_i32, %arg0 : i32, i32
  }
  func.func @transform_2(%arg0: i32) -> (i32, i32) {
    %c0_i32 = arith.constant 0 : i32
    %c0_i32_0 = arith.constant 0 : i32
    %c0_i32_1 = arith.constant 0 : i32
    return %c0_i32, %c0_i32_0 : i32, i32
  }
  func.func @transform_3(%arg0: i32) -> (i32, i32, i32) {
    %c0_i32 = arith.constant 0 : i32
    %c0_i32_0 = arith.constant 0 : i32
    %c0_i32_1 = arith.constant 0 : i32
    %c0_i32_2 = arith.constant 0 : i32
    return %c0_i32, %c0_i32_0, %c0_i32_1 : i32, i32, i32
  }
  func.func @transform_4(%arg0: i32) -> (i32, i32) {
    %c0_i32 = arith.constant 0 : i32
    %c0_i32_0 = arith.constant 0 : i32
    %c0_i32_1 = arith.constant 0 : i32
    return %c0_i32, %c0_i32_0 : i32, i32
  }
  func.func @transform_5(%arg0: i32) -> (i32, i32, i32) {
    %c0_i32 = arith.constant 0 : i32
    %c0_i32_0 = arith.constant 0 : i32
    %c0_i32_1 = arith.constant 0 : i32
    %c0_i32_2 = arith.constant 0 : i32
    return %c0_i32, %c0_i32_0, %c0_i32_1 : i32, i32, i32
  }
  func.func @transform_6(%arg0: i32) -> (i32, i32) {
    %c0_i32 = arith.constant 0 : i32
    %c0_i32_0 = arith.constant 0 : i32
    return %c0_i32, %arg0 : i32, i32
  }
}

</mosaic_0001>

<bundles_post_ra>
// kernel: stage_gumbel_forward.2
= control target key start
LH: loop header
LB: loop body
LE: loop exit
PB: predicated region body
PF: predicated region fallthrough
CT: control target
= control target key end

     0   :  { %s1216_s21 = smov 0   ;;  %s1842_s0 = inlined_call_operand.vmem [shape: bf16[8,768], index: 0, kind: input, shape index: {}]   ;;  %s1843_s1 = inlined_call_operand.vmem [shape: f32[1,768], index: 1, kind: input, shape index: {}]   ;;  %s1844_s2 = inlined_call_operand.vmem [shape: bf16[16,8], index: 2, kind: input, shape index: {}]   ;;  %s1845_s3 = inlined_call_operand.vmem [shape: f32[15,16,1], index: 3, kind: input, shape index: {}]   ;;  %s1846_s4 = inlined_call_operand.vmem [shape: bf16[8,16], index: 4, kind: input, shape index: {}]   ;;  %s1847_s5 = inlined_call_operand.vmem [shape: f32[2,8,1], index: 5, kind: input, shape index: {}]   ;;  %s1848_s6 = inlined_call_operand.vmem [shape: bf16[8,768], index: 6, kind: output, shape index: {}]  }
   0x1 LB: > { %s1099_s22 = sadd.s32 4294967295, %s1168_s21   ;;  %p1103_p0 = scmp.ge.s32.totalorder %s1168_s21, 1  ;;  %s1168_s21 = sphi %s1216_s21, %s16_s21  }
   0x2   : > { %p223_p1 = scmp.lt.s32.totalorder %s1168_s21, 3 }
   0x4   : > { %p224_p2 = pnand %p1103_p0, %p223_p1 }
   0x6   : > { %227 = sbr.rel (%p224_p2) target bundleno = 707 (0x2c3), region = 44 }
   0xd   : > { %s257_s23 = smul.u32 3, %s1099_s22  ;;  %v1170_v0 = vmov 0.0   ;;  %v1171_v1 = vmov 0   ;;  %v278_v2 = vld [vmem:[%s1845_s3] sm:$0xff]  ;;  %vm1172_vm0 = vmmov 0   ;;  %v280_v3 = vld [vmem:[%s1845_s3 + $0x10] sm:$0xff]  ;;  %v484_v38 = vlaneseq }
   0xe   : > { %1125 = vmatprep.subr.bf16.mxu1 %v1170_v0  ;;  %371 = vmatprep.mubr.bf16.mxu0 %v1171_v1  ;;  %v279_v4 = vld [vmem:[%s1845_s3 + $0x8] sm:$0xff]  ;;  %v281_v5 = vld [vmem:[%s1845_s3 + $0x18] sm:$0xff]  ;;  %vm329_vm1 = vcmask 1043456   ;;  %v282_v10 = vld [vmem:[%s1845_s3 + $0x20] sm:$0xff]  ;;  %vm325_vm2 = vcmask 64512   ;;  %s1173_s25 = smov 19  }
   0xf   : > { %p258_p3 = scmp.lt.s32.totalorder %s257_s23, 5  ;;  %1127 = vmatprep.mubr.msk.bf16.mxu1 %vm1172_vm0, %v1170_v0  ;;  %1156 = vset.pattern.permute.xlu0 %v1171_v1  ;;  %v1161_v12 = vld [vmem:[%s1844_s2] sm:$0xff]   ;;  %v283_v13 = vld [vmem:[%s1845_s3 + $0x28] sm:$0xff]  ;;  %v292_v19 = vld [vmem:[%s1845_s3 + $0x70] sm:$0xff]  ;;  %v1326_v40 = vshrl.u32 %v484_v38, 7  ;;  %s1174_s26 = smov 18  }
  0x10   : > { %425 = vperm.xlu0 %1156, %v278_v2   ;;  %1157 = vset.pattern.permute.xlu1 %v1171_v1  ;;  %v298_v15 = vld [vmem:[%s1845_s3 + $0xa0] sm:$0xff]  ;;  %v299_v16 = vld [vmem:[%s1845_s3 + $0xa8] sm:$0xff]  ;;  %v293_v20 = vld [vmem:[%s1845_s3 + $0x78] sm:$0xff]  ;;  %s1175_s27 = smov 17   ;;  %s1176_s28 = smov 1   ;;  %vm915_vm11 = vcmask 130048  }
  0x11   : > { %s1868_s23 = smov (!%p258_p3, %s257_s23), 5  ;;  %441 = vperm.xlu1 %1157, %v280_v3   ;;  %v290_v17 = vld [vmem:[%s1845_s3 + $0x60] sm:$0xff]  ;;  %v291_v18 = vld [vmem:[%s1845_s3 + $0x68] sm:$0xff]  ;;  %v296_v23 = vld [vmem:[%s1845_s3 + $0x90] sm:$0xff]  ;;  %v486_v53 = vsub.s32 0, %v1326_v40  ;;  %v494_v63 = vsub.s32 2, %v1326_v40 }
  0x12   : > { %s1104_s8 = sshll.u32 %s1868_s23, 2  ;;  %v294_v21 = vld [vmem:[%s1845_s3 + $0x80] sm:$0xff]  ;;  %v295_v22 = vld [vmem:[%s1845_s3 + $0x88] sm:$0xff]  ;;  %v297_v24 = vld [vmem:[%s1845_s3 + $0x98] sm:$0xff]  ;;  %s266_s24 = scalar_lea.vmem %s1843_s1, %s1868_s23 }
  0x13   : > { %s261_s11 = scalar_lea.vmem %s1842_s0, %s1104_s8  ;;  %v300_v25 = vld [vmem:[%s1845_s3 + $0xb0] sm:$0xff]  ;;  %v301_v26 = vld [vmem:[%s1845_s3 + $0xb8] sm:$0xff]  ;;  %v302_v27 = vld [vmem:[%s1845_s3 + $0xc0] sm:$0xff]  ;;  %s1177_s29 = smov 127  }
  0x14   : > { %430 = vperm.xlu0 %1156, %v279_v4   ;;  %v275_v6 = vld [vmem:[%s261_s11] sm:$0xff]  ;;  %v1160_v7 = vld [vmem:[%s261_s11 + $0x8] ss:$0 sps:$4 sm:$0xff]   ;;  %v304_v29 = vld [vmem:[%s1845_s3 + $0xd0] sm:$0xff]  ;;  %s1178_s30 = smov 111   ;;  %s1179_s7 = smov 110  }
  0x15   : > { %446 = vperm.xlu1 %1157, %v281_v5   ;;  %v1108_v8 = vcombine.high %v275_v6, %v275_v6  ;;  %v1107_v9 = vcombine.low %v275_v6, %v275_v6  ;;  %v337_v11 = vsel %vm329_vm1, %v1160_v7, 0  ;;  %v303_v28 = vld [vmem:[%s1845_s3 + $0xc8] sm:$0xff]  ;;  %v305_v30 = vld [vmem:[%s1845_s3 + $0xd8] sm:$0xff]  ;;  %v306_v31 = vld [vmem:[%s1845_s3 + $0xe0] sm:$0xff]  ;;  %s1180_s9 = smov 109  }
  0x16   : > { %1126 = vmatpush3.bf16.msra.mxu1 %v337_v11  ;;  %v307_v32 = vld [vmem:[%s1845_s3 + $0xe8] sm:$0xff]  ;;  %v284_v33 = vld [vmem:[%s1845_s3 + $0x30] sm:$0xff]  ;;  %v285_v34 = vld [vmem:[%s1845_s3 + $0x38] sm:$0xff] }
  0x17   : > { %1110 = vmatprep.subr.msk.bf16.mxu0 %vm329_vm1, %v1108_v8  ;;  %v331_v14 = vsel %vm329_vm1, %v1107_v9, 0  ;;  %1131 = vmatprep.subr.bf16.mxu1 %v1170_v0  ;;  %v286_v35 = vld [vmem:[%s1845_s3 + $0x40] sm:$0xff]  ;;  %v287_v36 = vld [vmem:[%s1845_s3 + $0x48] sm:$0xff] }
  0x18   : > { %340 = vmatpush1.bf16.msra.mxu0 %v331_v14  ;;  %469 = vperm.xlu0 %1156, %v282_v10   ;;  %v1341_v58 = vld [vmem:[%s266_s24] sm:$0x7]  ;;  %s272_s24 = scalar_lea.vmem %s1848_s6, %s1104_s8 }
  0x19   : > { %474 = vperm.xlu1 %1157, %v283_v13   ;;  %1128 = vmatmul.mubr.msk.bf16.vlgmr.msra.gmra.mrb[0].mxu1 %vm325_vm2, %v1161_v12  ;;  %v1348_v10 = vrot.slane %v1341_v58, %v494_v63 }
  0x1a   : > { %1133 = vmatprep.mubr.msk.bf16.mxu1 %vm1172_vm0, %v1170_v0 }
  0x1b   : > { %1111 = vmatmul.mubr.msk.bf16.vlgmr.msra.gmra.mrb[0].mxu0 %vm325_vm2, %v1161_v12  ;;  %1856 = vst [vmem:[#allocation3_spill] sm:$0xff] %v1348_v10 }
  0x1c   : > { %507 = vperm.xlu0 %1156, %v298_v15   ;;  %951 = vmatprep.mubr.bf16.mxu0 %v1171_v1  ;;  %v1345_v1 = vrot.slane %v1341_v58, %v486_v53  ;;  %v309_v53 = vld [vmem:[%s1847_s5 + $0x8] sm:$0xff] }
  0x1d   : > { %512 = vperm.xlu1 %1157, %v299_v16  }
  0x1e   : > { %1855 = vst [vmem:[#allocation2_spill] sm:$0xff] %v1345_v1 }
  0x20   : > { %544 = vperm.xlu0 %1156, %v290_v17  }
  0x21   : > { %549 = vperm.xlu1 %1157, %v291_v18  }
  0x24   : > { %585 = vperm.xlu0 %1156, %v292_v19  }
  0x25   : > { %590 = vperm.xlu1 %1157, %v293_v20  }
  0x28   : > { %626 = vperm.xlu0 %1156, %v294_v21  }
  0x29   : > { %631 = vperm.xlu1 %1157, %v295_v22  }
  0x2c   : > { %667 = vperm.xlu0 %1156, %v296_v23  }
  0x2d   : > { %672 = vperm.xlu1 %1157, %v297_v24   ;;  %v490_v24 = vsub.s32 1, %v1326_v40 }
  0x30   : > { %708 = vperm.xlu0 %1156, %v300_v25  }
  0x31   : > { %713 = vperm.xlu1 %1157, %v301_v26  }
  0x34   : > { %749 = vperm.xlu0 %1156, %v302_v27  }
  0x35   : > { %754 = vperm.xlu1 %1157, %v303_v28  }
  0x38   : > { %790 = vperm.xlu0 %1156, %v304_v29   ;;  %v1425_v29 = vrot.slane %v1341_v58, %v490_v24  ;;  %v1526_v58 = vand.u32 127, %v484_v38 }
  0x39   : > { %795 = vperm.xlu1 %1157, %v305_v30  }
  0x3a   : > { %1857 = vst [vmem:[#allocation4_spill] sm:$0xff] %v1425_v29  ;;  %vm535_vm3 = vcmp.lt.s32.totalorder %v1526_v58, 19  ;;  %vm576_vm4 = vcmp.lt.s32.totalorder %v1526_v58, 18  ;;  %vm617_vm5 = vcmp.lt.s32.totalorder %v1526_v58, 17  ;;  %vm658_vm6 = vcmp.lt.s32.totalorder %v1526_v58, 1 }
  0x3b   : > { %vm699_vm7 = vcmp.lt.s32.totalorder %v1526_v58, 127  ;;  %vm740_vm8 = vcmp.lt.s32.totalorder %v1526_v58, 111  ;;  %vm781_vm9 = vcmp.lt.s32.totalorder %v1526_v58, 110  ;;  %vm822_vm10 = vcmp.lt.s32.totalorder %v1526_v58, 109 }
  0x3c   : > { %831 = vperm.xlu0 %1156, %v306_v31  }
  0x3d   : > { %836 = vperm.xlu1 %1157, %v307_v32  }
  0x40   : > { %853 = vperm.xlu0 %1156, %v284_v33  }
  0x41   : > { %858 = vperm.xlu1 %1157, %v285_v34  }
  0x44   : > { %869 = vperm.xlu0 %1156, %v286_v35  }
  0x45   : > { %874 = vperm.xlu1 %1157, %v287_v36  }
  0x8f   : > { %v1321_v37 = vpop.permute.xlu0 %425 }
  0x90   : > { %v1323_v39 = vpop.permute.xlu1 %441 }
  0x93   : > { %v1328_v41 = vpop.permute.xlu0 %430 }
  0x94   : > { %v447_v54 = vpop.permute.xlu1 %446 }
  0x97   : > { %v470_v5 = vpop.permute.xlu0 %469 }
  0x98   : > { %v475_v9 = vpop.permute.xlu1 %474 }
  0x9b   : > { %v1416_v25 = vpop.permute.xlu0 %507 }
  0x9c   : > { %v1420_v27 = vpop.permute.xlu1 %512 }
  0x9f   : > { %v1429_v31 = vpop.permute.xlu0 %544 }
  0xa0   : > { %v1433_v33 = vpop.permute.xlu1 %549 }
  0xa3   : > { %v1445_v36 = vpop.permute.xlu0 %585 }
  0xec   : > { %v416_v42 = vpop.f32.mrb[0].mxu1 }
  0xed   : > { %v435_v44 = vmul.f32 %v1321_v37, %v416_v42  ;;  %v1129_v45 = vpop.f32.mrb[1].mxu1 }
  0xee   : > { %v373_v43 = vpop.f32.mrb[0].mxu0  ;;  %v419_v48 = vpop.f32.mrb[2].mxu1 }
  0xef   : > { %v433_v46 = vmul.f32 %v1321_v37, %v373_v43  ;;  %v375_v47 = vpop.f32.mrb[1].mxu0  ;;  %v451_v49 = vadd.f32 %v1323_v39, %v435_v44  ;;  %v438_v51 = vmul.f32 %v1328_v41, %v419_v48  ;;  %v1130_v52 = vpop.f32.mrb[3].mxu1  ;;  %v288_v48 = vld [vmem:[%s1845_s3 + $0x50] sm:$0xff] }
  0xf0   : > { %v377_v50 = vpop.f32.mrb[2].mxu0  ;;  %v434_v18 = vmul.f32 %v1321_v37, %v375_v47  ;;  %v1449_v37 = vpop.permute.xlu1 %590 }
  0xf1   : > { %v449_v55 = vadd.f32 %v1323_v39, %v433_v46  ;;  %v436_v56 = vmul.f32 %v1328_v41, %v377_v50  ;;  %v379_v57 = vpop.f32.mrb[3].mxu0  ;;  %v457_v59 = vmax.f32 %v451_v49, 0.0  ;;  %v454_v60 = vadd.f32 %v447_v54, %v438_v51  ;;  %v289_v50 = vld [vmem:[%s1845_s3 + $0x58] sm:$0xff]  ;;  %v308_v51 = vld [vmem:[%s1847_s5] sm:$0xff] }
  0xf2   : > { %v437_v19 = vmul.f32 %v1328_v41, %v379_v57  ;;  %v450_v20 = vadd.f32 %v1323_v39, %v434_v18  ;;  %v1455_v39 = vpop.permute.xlu0 %626 }
  0xf3   : > { %v455_v61 = vmax.f32 %v449_v55, 0.0  ;;  %v452_v62 = vadd.f32 %v447_v54, %v436_v56  ;;  %v460_v0 = vmax.f32 %v454_v60, 0.0  ;;  %v463_v3 = vmin.f32 %v457_v59, 6.0 }
  0xf4   : > { %v453_v21 = vadd.f32 %v447_v54, %v437_v19  ;;  %v456_v22 = vmax.f32 %v450_v20, 0.0  ;;  %v1459_v40 = vpop.permute.xlu1 %631 }
  0xf5   : > { %v461_v2 = vmin.f32 %v455_v61, 6.0  ;;  %v458_v4 = vmax.f32 %v452_v62, 0.0  ;;  %v466_v8 = vmin.f32 %v460_v0, 6.0  ;;  %v479_v12 = vmul.f32 %v470_v5, %v463_v3 }
  0xf6   : > { %v459_v23 = vmax.f32 %v453_v21, 0.0  ;;  %v462_v26 = vmin.f32 %v456_v22, 6.0  ;;  %v1465_v41 = vpop.permute.xlu0 %667 }
  0xf7   : > { %v477_v6 = vmul.f32 %v470_v5, %v461_v2  ;;  %v464_v7 = vmin.f32 %v458_v4, 6.0  ;;  %v482_v15 = vmul.f32 %v475_v9, %v466_v8  ;;  %v1359_v16 = vmul.f32 %v1348_v10, %v479_v12 }
  0xf8   : > { %v465_v28 = vmin.f32 %v459_v23, 6.0  ;;  %v478_v30 = vmul.f32 %v470_v5, %v462_v26  ;;  %v1469_v42 = vpop.permute.xlu1 %672 }
  0xf9   : > { %v1351_v11 = vmul.f32 %v1345_v1, %v477_v6  ;;  %v480_v13 = vmul.f32 %v475_v9, %v464_v7  ;;  %v1364_v17 = vmul.f32 %v1348_v10, %v482_v15 }
  0xfa   : > { %v481_v32 = vmul.f32 %v475_v9, %v465_v28  ;;  %v1436_v34 = vmul.f32 %v1425_v29, %v478_v30  ;;  %v1475_v43 = vpop.permute.xlu0 %708 }
  0xfb   : > { %v1354_v14 = vmul.f32 %v1345_v1, %v480_v13  ;;  %521 = vrot.lane.b32.xlu0 %v1351_v11, %s1173_s25  ;;  %v515_v5 = vmul.f32 %v1416_v25, %v1351_v11  ;;  %v517_v1 = vmul.f32 %v1416_v25, %v1359_v16 }
  0xfc   : > { %v1441_v35 = vmul.f32 %v1425_v29, %v481_v32  ;;  %v1479_v44 = vpop.permute.xlu1 %713 }
  0xfd   : > { %523 = vrot.lane.b32.xlu1 %v1354_v14, %s1173_s25  ;;  %v518_v12 = vmul.f32 %v1420_v27, %v1354_v14 }
  0xfe   : > { %v1485_v45 = vpop.permute.xlu0 %749 }
  0xff   : > { %529 = vrot.lane.b32.xlu0 %v1359_v16, %s1173_s25 }
 0x100   : > { %v1489_v46 = vpop.permute.xlu1 %754 }
 0x101   : > { %531 = vrot.lane.b32.xlu1 %v1364_v17, %s1173_s25 }
 0x102   : > { %v1495_v47 = vpop.permute.xlu0 %790 }
 0x103   : > { %564 = vrot.lane.b32.xlu0 %v1351_v11, %s1174_s26 }
 0x104   : > { %v1502_v49 = vpop.permute.xlu1 %795 }
 0x105   : > { %566 = vrot.lane.b32.xlu1 %v1354_v14, %s1174_s26 }
 0x106   : > { %v1512_v52 = vpop.permute.xlu0 %831 }
 0x107   : > { %572 = vrot.lane.b32.xlu0 %v1359_v16, %s1174_s26 }
 0x108   : > { %v1517_v54 = vpop.permute.xlu1 %836 }
 0x109   : > { %574 = vrot.lane.b32.xlu1 %v1364_v17, %s1174_s26 }
 0x10a   : > { %v1519_v55 = vpop.permute.xlu0 %853 }
 0x10b   : > { %605 = vrot.lane.b32.xlu0 %v1351_v11, %s1175_s27 }
 0x10c   : > { %v1521_v56 = vpop.permute.xlu1 %858 }
 0x10d   : > { %607 = vrot.lane.b32.xlu1 %v1354_v14, %s1175_s27  ;;  %1858 = vst [vmem:[#allocation5_spill] sm:$0xff] %v1521_v56  ;;  %v516_v56 = vmul.f32 %v1416_v25, %v1436_v34 }
 0x10e   : > { %v1523_v57 = vpop.permute.xlu0 %869 }
 0x10f   : > { %613 = vrot.lane.b32.xlu0 %v1359_v16, %s1175_s27  ;;  %1859 = vst [vmem:[#allocation6_spill] sm:$0xff] %v1523_v57 }
 0x110   : > { %v1528_v59 = vpop.permute.xlu1 %874 }
 0x111   : > { %615 = vrot.lane.b32.xlu1 %v1364_v17, %s1175_s27  ;;  %1860 = vst [vmem:[#allocation7_spill] sm:$0xff] %v1528_v59 }
 0x113   : > { %646 = vrot.lane.b32.xlu0 %v1351_v11, %s1176_s28 }
 0x115   : > { %648 = vrot.lane.b32.xlu1 %v1354_v14, %s1176_s28 }
 0x117   : > { %654 = vrot.lane.b32.xlu0 %v1359_v16, %s1176_s28 }
 0x119   : > { %656 = vrot.lane.b32.xlu1 %v1364_v17, %s1176_s28 }
 0x11b   : > { %695 = vrot.lane.b32.xlu0 %v1359_v16, %s1177_s29 }
 0x11d   : > { %697 = vrot.lane.b32.xlu1 %v1364_v17, %s1177_s29 }
 0x11f   : > { %687 = vrot.lane.b32.xlu0 %v1351_v11, %s1177_s29 }
 0x121   : > { %689 = vrot.lane.b32.xlu1 %v1354_v14, %s1177_s29 }
 0x123   : > { %736 = vrot.lane.b32.xlu0 %v1359_v16, %s1178_s30 }
 0x125   : > { %738 = vrot.lane.b32.xlu1 %v1364_v17, %s1178_s30 }
 0x127   : > { %728 = vrot.lane.b32.xlu0 %v1351_v11, %s1178_s30 }
 0x129   : > { %730 = vrot.lane.b32.xlu1 %v1354_v14, %s1178_s30 }
 0x12b   : > { %777 = vrot.lane.b32.xlu0 %v1359_v16, %s1179_s7 }
 0x12d   : > { %779 = vrot.lane.b32.xlu1 %v1364_v17, %s1179_s7 }
 0x12f   : > { %769 = vrot.lane.b32.xlu0 %v1351_v11, %s1179_s7 }
 0x131   : > { %771 = vrot.lane.b32.xlu1 %v1354_v14, %s1179_s7 }
 0x133   : > { %818 = vrot.lane.b32.xlu0 %v1359_v16, %s1180_s9 }
 0x135   : > { %820 = vrot.lane.b32.xlu1 %v1364_v17, %s1180_s9 }
 0x137   : > { %525 = vrot.lane.b32.xlu0 %v1436_v34, %s1173_s25 }
 0x139   : > { %527 = vrot.lane.b32.xlu1 %v1441_v35, %s1173_s25 }
 0x13b   : > { %568 = vrot.lane.b32.xlu0 %v1436_v34, %s1174_s26 }
 0x13d   : > { %570 = vrot.lane.b32.xlu1 %v1441_v35, %s1174_s26 }
 0x13f   : > { %609 = vrot.lane.b32.xlu0 %v1436_v34, %s1175_s27 }
 0x141   : > { %611 = vrot.lane.b32.xlu1 %v1441_v35, %s1175_s27 }
 0x143   : > { %650 = vrot.lane.b32.xlu0 %v1436_v34, %s1176_s28 }
 0x145   : > { %652 = vrot.lane.b32.xlu1 %v1441_v35, %s1176_s28 }
 0x147   : > { %691 = vrot.lane.b32.xlu0 %v1436_v34, %s1177_s29 }
 0x149   : > { %693 = vrot.lane.b32.xlu1 %v1441_v35, %s1177_s29 }
 0x14b   : > { %732 = vrot.lane.b32.xlu0 %v1436_v34, %s1178_s30 }
 0x14d   : > { %734 = vrot.lane.b32.xlu1 %v1441_v35, %s1178_s30 }
 0x14f   : > { %773 = vrot.lane.b32.xlu0 %v1436_v34, %s1179_s7 }
 0x151   : > { %775 = vrot.lane.b32.xlu1 %v1441_v35, %s1179_s7 }
 0x153   : > { %814 = vrot.lane.b32.xlu0 %v1436_v34, %s1180_s9 }
 0x155   : > { %816 = vrot.lane.b32.xlu1 %v1441_v35, %s1180_s9 }
 0x157   : > { %810 = vrot.lane.b32.xlu0 %v1351_v11, %s1180_s9 }
 0x159   : > { %812 = vrot.lane.b32.xlu1 %v1354_v14, %s1180_s9 }
 0x15b   : > { %897 = vperm.xlu0 %1156, %v288_v48  }
 0x15d   : > { %902 = vperm.xlu1 %1157, %v289_v50  }
 0x15f   : > { %1002 = vperm.xlu0 %1156, %v308_v51  }
 0x161   : > { %1010 = vperm.xlu1 %1157, %v309_v53  }
 0x16d   : > { %v1530_v60 = vpop.permute.xlu0 %521 }
 0x16f   : > { %v1532_v61 = vpop.permute.xlu1 %523 }
 0x171   : > { %v530_v62 = vpop.permute.xlu0 %529 }
 0x172   : > { %v540_v63 = vsel %vm535_vm3, %v530_v62, %v1530_v60 }
 0x173   : > { %v1538_v0 = vpop.permute.xlu1 %531  ;;  %v552_v3 = vmul.f32 %v1429_v31, %v540_v63 }
 0x174   : > { %v541_v38 = vsel %vm535_vm3, %v1538_v0, %v1532_v61 }
 0x175   : > { %v1544_v2 = vpop.permute.xlu0 %564  ;;  %v555_v6 = vmul.f32 %v1433_v33, %v541_v38  ;;  %v558_v9 = vadd.f32 %v552_v3, %v515_v5 }
 0x177   : > { %v1547_v4 = vpop.permute.xlu1 %566  ;;  %v561_v18 = vadd.f32 %v555_v6, %v518_v12 }
 0x179   : > { %v1553_v7 = vpop.permute.xlu0 %572 }
 0x17a   : > { %v581_v8 = vsel %vm576_vm4, %v1553_v7, %v1544_v2 }
 0x17b   : > { %v593_v13 = vmul.f32 %v1445_v36, %v581_v8  ;;  %v1562_v15 = vpop.permute.xlu1 %574 }
 0x17c   : > { %v582_v11 = vsel %vm576_vm4, %v1562_v15, %v1547_v4 }
 0x17d   : > { %v599_v19 = vadd.f32 %v593_v13, %v558_v9  ;;  %v596_v20 = vmul.f32 %v1449_v37, %v582_v11  ;;  %v1569_v21 = vpop.permute.xlu0 %605 }
 0x17f   : > { %v602_v22 = vadd.f32 %v596_v20, %v561_v18  ;;  %v1571_v23 = vpop.permute.xlu1 %607 }
 0x181   : > { %v1574_v14 = vpop.permute.xlu0 %613 }
 0x182   : > { %v622_v24 = vsel %vm617_vm5, %v1574_v14, %v1569_v21 }
 0x183   : > { %v634_v26 = vmul.f32 %v1455_v39, %v622_v24  ;;  %v1581_v28 = vpop.permute.xlu1 %615 }
 0x184   : > { %v623_v30 = vsel %vm617_vm5, %v1581_v28, %v1571_v23 }
 0x185   : > { %v640_v32 = vadd.f32 %v634_v26, %v599_v19  ;;  %v637_v48 = vmul.f32 %v1459_v40, %v623_v30  ;;  %v1588_v50 = vpop.permute.xlu0 %646 }
 0x187   : > { %v643_v51 = vadd.f32 %v637_v48, %v602_v22  ;;  %v1590_v53 = vpop.permute.xlu1 %648 }
 0x189   : > { %v1593_v63 = vpop.permute.xlu0 %654 }
 0x18a   : > { %v663_v38 = vsel %vm658_vm6, %v1593_v63, %v1588_v50 }
 0x18b   : > { %v675_v3 = vmul.f32 %v1465_v41, %v663_v38  ;;  %v1600_v5 = vpop.permute.xlu1 %656 }
 0x18c   : > { %v664_v6 = vsel %vm658_vm6, %v1600_v5, %v1590_v53 }
 0x18d   : > { %v1606_v8 = vadd.f32 %v675_v3, %v640_v32  ;;  %v678_v9 = vmul.f32 %v1469_v42, %v664_v6  ;;  %v1609_v12 = vpop.permute.xlu0 %695 }
 0x18f   : > { %v1611_v13 = vadd.f32 %v678_v9, %v643_v51  ;;  %v1613_v11 = vpop.permute.xlu1 %697 }
 0x191   : > { %v1615_v18 = vpop.permute.xlu0 %687 }
 0x193   : > { %v1617_v19 = vpop.permute.xlu1 %689 }
 0x195   : > { %v1619_v20 = vpop.permute.xlu0 %736 }
 0x197   : > { %v1621_v22 = vpop.permute.xlu1 %738 }
 0x199   : > { %v1623_v24 = vpop.permute.xlu0 %728 }
 0x19b   : > { %v1625_v26 = vpop.permute.xlu1 %730 }
 0x19d   : > { %v1627_v30 = vpop.permute.xlu0 %777 }
 0x19f   : > { %v1629_v32 = vpop.permute.xlu1 %779 }
 0x1a1   : > { %v1631_v48 = vpop.permute.xlu0 %769 }
 0x1a3   : > { %v1633_v51 = vpop.permute.xlu1 %771 }
 0x1a5   : > { %v1635_v38 = vpop.permute.xlu0 %818 }
 0x1a7   : > { %v1637_v3 = vpop.permute.xlu1 %820 }
 0x1a9   : > { %v526_v6 = vpop.permute.xlu0 %525 }
 0x1aa   : > { %v536_v9 = vsel %vm535_vm3, %v526_v6, %v530_v62  ;;  %v538_v29 = vsel %vm535_vm3, %v1530_v60, %v526_v6  ;;  %v520_v62 = vmul.f32 %v1420_v27, %v1364_v17  ;;  %v704_v17 = vsel %vm699_vm7, %v1609_v12, %v1615_v18 }
 0x1ab   : > { %v553_v10 = vmul.f32 %v1429_v31, %v538_v29  ;;  %v554_v59 = vmul.f32 %v1429_v31, %v536_v9  ;;  %v528_v57 = vpop.permute.xlu1 %527  ;;  %v519_v29 = vmul.f32 %v1420_v27, %v1441_v35 }
 0x1ac   : > { %v537_v60 = vsel %vm535_vm3, %v528_v57, %v1538_v0  ;;  %v539_v6 = vsel %vm535_vm3, %v1532_v61, %v528_v57  ;;  %v705_v61 = vsel %vm699_vm7, %v1613_v11, %v1617_v19 }
 0x1ad   : > { %v560_v16 = vadd.f32 %v554_v59, %v517_v1  ;;  %v556_v31 = vmul.f32 %v1433_v33, %v539_v6  ;;  %v557_v9 = vmul.f32 %v1433_v33, %v537_v60  ;;  %v569_v25 = vpop.permute.xlu0 %568  ;;  %v559_v27 = vadd.f32 %v553_v10, %v516_v56 }
 0x1ae   : > { %v577_v34 = vsel %vm576_vm4, %v569_v25, %v1553_v7  ;;  %v579_v1 = vsel %vm576_vm4, %v1544_v2, %v569_v25  ;;  %v718_v6 = vmul.f32 %v1475_v43, %v704_v17  ;;  %v721_v25 = vmul.f32 %v1479_v44, %v705_v61 }
 0x1af   : > { %v563_v35 = vadd.f32 %v557_v9, %v520_v62  ;;  %v594_v33 = vmul.f32 %v1445_v36, %v579_v1  ;;  %v595_v57 = vmul.f32 %v1445_v36, %v577_v34  ;;  %v571_v59 = vpop.permute.xlu1 %570  ;;  %v562_v0 = vadd.f32 %v556_v31, %v519_v29 }
 0x1b0   : > { %v578_v7 = vsel %vm576_vm4, %v571_v59, %v1562_v15  ;;  %v580_v10 = vsel %vm576_vm4, %v1547_v4, %v571_v59  ;;  %v745_v17 = vsel %vm740_vm8, %v1619_v20, %v1623_v24 }
 0x1b1   : > { %v600_v56 = vadd.f32 %v594_v33, %v559_v27  ;;  %v601_v2 = vadd.f32 %v595_v57, %v560_v16  ;;  %v597_v62 = vmul.f32 %v1449_v37, %v580_v10  ;;  %v598_v36 = vmul.f32 %v1449_v37, %v578_v7  ;;  %v610_v60 = vpop.permute.xlu0 %609 }
 0x1b2   : > { %v618_v29 = vsel %vm617_vm5, %v610_v60, %v1574_v14  ;;  %v620_v15 = vsel %vm617_vm5, %v1569_v21, %v610_v60  ;;  %v746_v33 = vsel %vm740_vm8, %v1621_v22, %v1625_v26  ;;  %v759_v10 = vmul.f32 %v1485_v45, %v745_v17 }
 0x1b3   : > { %v603_v4 = vadd.f32 %v597_v62, %v562_v0  ;;  %v604_v31 = vadd.f32 %v598_v36, %v563_v35  ;;  %v635_v16 = vmul.f32 %v1455_v39, %v620_v15  ;;  %v636_v9 = vmul.f32 %v1455_v39, %v618_v29  ;;  %v612_v37 = vpop.permute.xlu1 %611 }
 0x1b4   : > { %v619_v14 = vsel %vm617_vm5, %v612_v37, %v1581_v28  ;;  %v621_v21 = vsel %vm617_vm5, %v1571_v23, %v612_v37  ;;  %v786_v28 = vsel %vm781_vm9, %v1627_v30, %v1631_v48  ;;  %v762_v29 = vmul.f32 %v1489_v46, %v746_v33 }
 0x1b5   : > { %v641_v34 = vadd.f32 %v635_v16, %v600_v56  ;;  %v642_v1 = vadd.f32 %v636_v9, %v601_v2  ;;  %v638_v39 = vmul.f32 %v1459_v40, %v621_v21  ;;  %v639_v27 = vmul.f32 %v1459_v40, %v619_v14  ;;  %v651_v35 = vpop.permute.xlu0 %650 }
 0x1b6   : > { %v659_v23 = vsel %vm658_vm6, %v651_v35, %v1593_v63  ;;  %v661_v57 = vsel %vm658_vm6, %v1588_v50, %v651_v35  ;;  %v787_v56 = vsel %vm781_vm9, %v1629_v32, %v1633_v51  ;;  %v800_v15 = vmul.f32 %v1495_v47, %v786_v28 }
 0x1b7   : > { %v644_v40 = vadd.f32 %v638_v39, %v603_v4  ;;  %v645_v59 = vadd.f32 %v639_v27, %v604_v31  ;;  %v676_v61 = vmul.f32 %v1465_v41, %v661_v57  ;;  %v677_v0 = vmul.f32 %v1465_v41, %v659_v23  ;;  %v653_v7 = vpop.permute.xlu1 %652 }
 0x1b8   : > { %v660_v63 = vsel %vm658_vm6, %v653_v7, %v1600_v5  ;;  %v662_v50 = vsel %vm658_vm6, %v1590_v53, %v653_v7 }
 0x1b9   : > { %v682_v2 = vadd.f32 %v676_v61, %v641_v34  ;;  %v683_v62 = vadd.f32 %v677_v0, %v642_v1  ;;  %v679_v41 = vmul.f32 %v1469_v42, %v662_v50  ;;  %v680_v36 = vmul.f32 %v1469_v42, %v660_v63  ;;  %v692_v60 = vpop.permute.xlu0 %691 }
 0x1ba   : > { %v700_v4 = vsel %vm699_vm7, %v692_v60, %v1609_v12  ;;  %v702_v5 = vsel %vm699_vm7, %v1615_v18, %v692_v60  ;;  %v803_v42 = vmul.f32 %v1502_v49, %v787_v56 }
 0x1bb   : > { %v724_v53 = vadd.f32 %v718_v6, %v683_v62  ;;  %v685_v31 = vadd.f32 %v679_v41, %v644_v40  ;;  %v686_v16 = vadd.f32 %v680_v36, %v645_v59  ;;  %v716_v9 = vmul.f32 %v1475_v43, %v702_v5  ;;  %v694_v37 = vpop.permute.xlu1 %693 }
 0x1bc   : > { %v717_v17 = vmul.f32 %v1475_v43, %v700_v4  ;;  %v701_v14 = vsel %vm699_vm7, %v694_v37, %v1613_v11  ;;  %v703_v12 = vsel %vm699_vm7, %v1617_v19, %v694_v37 }
 0x1bd   : > { %v727_v21 = vadd.f32 %v721_v25, %v686_v16  ;;  %v722_v18 = vadd.f32 %v716_v9, %v1606_v8  ;;  %v719_v6 = vmul.f32 %v1479_v44, %v703_v12  ;;  %v720_v34 = vmul.f32 %v1479_v44, %v701_v14  ;;  %v733_v1 = vpop.permute.xlu0 %732 }
 0x1be   : > { %v723_v39 = vadd.f32 %v717_v17, %v682_v2  ;;  %v741_v43 = vsel %vm740_vm8, %v733_v1, %v1619_v20  ;;  %v743_v11 = vsel %vm740_vm8, %v1623_v24, %v733_v1  ;;  %v765_v27 = vadd.f32 %v759_v10, %v724_v53 }
 0x1bf   : > { %v725_v19 = vadd.f32 %v719_v6, %v1611_v13  ;;  %v726_v25 = vadd.f32 %v720_v34, %v685_v31  ;;  %v757_v8 = vmul.f32 %v1485_v45, %v743_v11  ;;  %v758_v35 = vmul.f32 %v1485_v45, %v741_v43  ;;  %v735_v33 = vpop.permute.xlu1 %734 }
 0x1c0   : > { %v742_v44 = vsel %vm740_vm8, %v735_v33, %v1621_v22  ;;  %v744_v20 = vsel %vm740_vm8, %v1625_v26, %v735_v33  ;;  %v806_v28 = vadd.f32 %v800_v15, %v765_v27  ;;  %v768_v23 = vadd.f32 %v762_v29, %v727_v21 }
 0x1c1   : > { %v763_v24 = vadd.f32 %v757_v8, %v722_v18  ;;  %v764_v57 = vadd.f32 %v758_v35, %v723_v39  ;;  %v760_v13 = vmul.f32 %v1489_v46, %v744_v20  ;;  %v761_v40 = vmul.f32 %v1489_v46, %v742_v44  ;;  %v774_v59 = vpop.permute.xlu0 %773  ;;  %v1861_v18 = vld [vmem:[#allocation5_spill] sm:$0xff] }
 0x1c2   : > { %v782_v45 = vsel %vm781_vm9, %v774_v59, %v1627_v30  ;;  %v784_v22 = vsel %vm781_vm9, %v1631_v48, %v774_v59  ;;  %v809_v26 = vadd.f32 %v803_v42, %v768_v23 }
 0x1c3   : > { %v766_v61 = vadd.f32 %v760_v13, %v725_v19  ;;  %v767_v0 = vadd.f32 %v761_v40, %v726_v25  ;;  %v798_v7 = vmul.f32 %v1495_v47, %v784_v22  ;;  %v799_v10 = vmul.f32 %v1495_v47, %v782_v45  ;;  %v776_v56 = vpop.permute.xlu1 %775  ;;  %v1863_v25 = vld [vmem:[#allocation7_spill] sm:$0xff] }
 0x1c4   : > { %v783_v46 = vsel %vm781_vm9, %v776_v56, %v1629_v32  ;;  %v785_v30 = vsel %vm781_vm9, %v1633_v51, %v776_v56 }
 0x1c5   : > { %v804_v63 = vadd.f32 %v798_v7, %v763_v24  ;;  %v805_v48 = vadd.f32 %v799_v10, %v764_v57  ;;  %v801_v50 = vmul.f32 %v1502_v49, %v785_v30  ;;  %v802_v2 = vmul.f32 %v1502_v49, %v783_v46  ;;  %v815_v62 = vpop.permute.xlu0 %814 }
 0x1c6   : > { %v823_v47 = vsel %vm822_vm10, %v815_v62, %v1635_v38 }
 0x1c7   : > { %v807_v41 = vadd.f32 %v801_v50, %v766_v61  ;;  %v808_v36 = vadd.f32 %v802_v2, %v767_v0  ;;  %v840_v60 = vmul.f32 %v1512_v52, %v823_v47  ;;  %v817_v32 = vpop.permute.xlu1 %816  ;;  %v911_v50 = vld [vmem:[%s1846_s4] sm:$0xf] }
 0x1c8   : > { %v824_v51 = vsel %vm822_vm10, %v817_v32, %v1637_v3 }
 0x1c9   : > { %v846_v29 = vadd.f32 %v840_v60, %v805_v48  ;;  %v843_v15 = vmul.f32 %v1517_v54, %v824_v51  ;;  %v811_v4 = vpop.permute.xlu0 %810 }
 0x1ca   : > { %v825_v49 = vsel %vm822_vm10, %v811_v4, %v815_v62  ;;  %v827_v5 = vsel %vm822_vm10, %v1635_v38, %v811_v4 }
 0x1cb   : > { %v849_v53 = vadd.f32 %v843_v15, %v808_v36  ;;  %v839_v31 = vmul.f32 %v1512_v52, %v825_v49  ;;  %v841_v16 = vmul.f32 %v1512_v52, %v827_v5  ;;  %v813_v9 = vpop.permute.xlu1 %812  ;;  %v862_v21 = vmul.f32 %v1519_v55, %v846_v29 }
 0x1cc   : > { %v826_v37 = vsel %vm822_vm10, %v813_v9, %v817_v32  ;;  %v828_v42 = vsel %vm822_vm10, %v1637_v3, %v813_v9  ;;  %v1862_v3 = vld [vmem:[#allocation6_spill] sm:$0xff] }
 0x1cd   : > { %v845_v17 = vadd.f32 %v839_v31, %v804_v63  ;;  %v847_v14 = vadd.f32 %v841_v16, %v806_v28  ;;  %v842_v12 = vmul.f32 %v1517_v54, %v826_v37  ;;  %v844_v38 = vmul.f32 %v1517_v54, %v828_v42  ;;  %v1864_v16 = vld [vmem:[#allocation3_spill] sm:$0xff]  ;;  %v1865_v42 = vld [vmem:[#allocation2_spill] sm:$0xff] }
 0x1ce   : > { %v865_v6 = vmul.f32 %v1861_v18, %v849_v53  ;;  %v878_v27 = vadd.f32 %v1862_v3, %v862_v21 }
 0x1cf   : > { %v861_v52 = vmul.f32 %v1519_v55, %v845_v17  ;;  %v863_v34 = vmul.f32 %v1519_v55, %v847_v14  ;;  %v848_v1 = vadd.f32 %v842_v12, %v807_v41  ;;  %v850_v39 = vadd.f32 %v844_v38, %v809_v26  ;;  %v1866_v12 = vld [vmem:[#allocation4_spill] sm:$0xff] }
 0x1d0   : > { %v881_v8 = vadd.f32 %v1863_v25, %v865_v6  ;;  %v884_v55 = vmax.f32 %v878_v27, 0.0 }
 0x1d1   : > { %v864_v43 = vmul.f32 %v1861_v18, %v848_v1  ;;  %v866_v58 = vmul.f32 %v1861_v18, %v850_v39  ;;  %v877_v11 = vadd.f32 %v1862_v3, %v861_v52  ;;  %v879_v19 = vadd.f32 %v1862_v3, %v863_v34 }
 0x1d2   : > { %v887_v23 = vmax.f32 %v881_v8, 0.0  ;;  %v890_v13 = vmin.f32 %v884_v55, 6.0 }
 0x1d3   : > { %v880_v54 = vadd.f32 %v1863_v25, %v864_v43  ;;  %v882_v35 = vadd.f32 %v1863_v25, %v866_v58  ;;  %v883_v33 = vmax.f32 %v877_v11, 0.0  ;;  %v885_v44 = vmax.f32 %v879_v19, 0.0 }
 0x1d4   : > { %v893_v22 = vmin.f32 %v887_v23, 6.0 }
 0x1d5   : > { %v886_v20 = vmax.f32 %v880_v54, 0.0  ;;  %v888_v28 = vmax.f32 %v882_v35, 0.0  ;;  %v889_v24 = vmin.f32 %v883_v33, 6.0  ;;  %v891_v40 = vmin.f32 %v885_v44, 6.0 }
 0x1d7   : > { %v892_v59 = vmin.f32 %v886_v20, 6.0  ;;  %v894_v45 = vmin.f32 %v888_v28, 6.0 }
 0x1da   : > { %v898_v57 = vpop.permute.xlu0 %897 }
 0x1db   : > { %v905_v26 = vmul.f32 %v898_v57, %v889_v24  ;;  %v906_v61 = vmul.f32 %v898_v57, %v890_v13  ;;  %v907_v7 = vmul.f32 %v898_v57, %v891_v40 }
 0x1dc   : > { %v903_v0 = vpop.permute.xlu1 %902 }
 0x1dd   : > { %v908_v10 = vmul.f32 %v903_v0, %v892_v59  ;;  %v909_v56 = vmul.f32 %v903_v0, %v893_v22  ;;  %v910_v46 = vmul.f32 %v903_v0, %v894_v45 }
 0x1de   : > { %v1003_v2 = vpop.permute.xlu0 %1002 }
 0x1df   : > { %v912_v30 = vpack.c.bf16 %v908_v10, %v905_v26  ;;  %v914_v63 = vpack.c.bf16 %v910_v46, %v907_v7  ;;  %v913_v48 = vpack.c.bf16 %v909_v56, %v906_v61 }
 0x1e0   : > { %v1011_v62 = vpop.permute.xlu1 %1010 }
 0x1e1   : > { %919 = vmatprep.subr.bf16.mxu0 %v913_v48  ;;  %1132 = vmatpush3.bf16.msra.mxu1 %v914_v63 }
 0x1e2   : > { %920 = vmatpush1.bf16.msra.mxu0 %v912_v30 }
 0x1e4   : > { %1134 = vmatmul.mubr.msk.bf16.vlgmr.msra.gmra.mrb[4].mxu1 %vm915_vm11, %v911_v50 }
 0x1e5   : > { %1113 = vmatmul.mubr.msk.bf16.vlgmr.msra.gmra.mrb[4].mxu0 %vm915_vm11, %v911_v50 }
 0x2b7   : > { %v994_v47 = vpop.f32.mrb[4].mxu1 }
 0x2b8   : > { %v1007_v41 = vmul.f32 %v1003_v2, %v994_v47  ;;  %v953_v36 = vpop.f32.mrb[4].mxu0  ;;  %v1135_v60 = vpop.f32.mrb[5].mxu1 }
 0x2b9   : > { %v1005_v32 = vmul.f32 %v1003_v2, %v953_v36  ;;  %v955_v51 = vpop.f32.mrb[5].mxu0  ;;  %v997_v29 = vpop.f32.mrb[6].mxu1 }
 0x2ba   : > { %v1015_v15 = vadd.f32 %v1011_v62, %v1007_v41  ;;  %v1006_v4 = vmul.f32 %v1003_v2, %v955_v51  ;;  %v957_v49 = vpop.f32.mrb[6].mxu0  ;;  %v1136_v5 = vpop.f32.mrb[7].mxu1 }
 0x2bb   : > { %v1013_v53 = vadd.f32 %v1011_v62, %v1005_v32  ;;  %v958_v31 = vpop.f32.mrb[7].mxu0 }
 0x2bc   : > { %v1018_v9 = vmul.f32 %v1015_v15, %v1864_v16  ;;  %v1014_v37 = vadd.f32 %v1011_v62, %v1006_v4 }
 0x2bd   : > { %v1016_v17 = vmul.f32 %v1013_v53, %v1865_v42 }
 0x2be   : > { %v1120_v14 = vpack.c.bf16 %v1018_v9, %v1018_v9  ;;  %v1017_v21 = vmul.f32 %v1014_v37, %v1866_v12 }
 0x2c0   : > { %1033 = vst [vmem:[%s272_s24 + $0x8] sm:$0xf] %v1120_v14  ;;  %v1119_v38 = vpack.c.bf16 %v1017_v21, %v1016_v17 }
 0x2c2   : > { %1032 = vst [vmem:[%s272_s24] sm:$0xff] %v1119_v38 }
 0x2c3 PF: > { %s16_s21 = sadd.s32 1, %s1168_s21  }
 0x2c4   : > { %p13_p4 = scmp.ge.s32.totalorder %s16_s21, 4  }
 0x2c6   :  { %15 = sbr.rel (!%p13_p4) target bundleno = 1 (0x1), region = 77 }

// kernel: stage_gumbel_forward.3
= control target key start
LH: loop header
LB: loop body
LE: loop exit
PB: predicated region body
PF: predicated region fallthrough
CT: control target
= control target key end

     0   :  { %s826_s21 = smov 0   ;;  %s987_s0 = inlined_call_operand.vmem [shape: bf16[8,256], index: 0, kind: input, shape index: {}]   ;;  %s988_s1 = inlined_call_operand.vmem [shape: f32[1,256], index: 1, kind: input, shape index: {}]   ;;  %s989_s2 = inlined_call_operand.vmem [shape: bf16[16,8], index: 2, kind: input, shape index: {}]   ;;  %s990_s3 = inlined_call_operand.vmem [shape: f32[15,16,1], index: 3, kind: input, shape index: {}]   ;;  %s991_s4 = inlined_call_operand.vmem [shape: bf16[8,16], index: 4, kind: input, shape index: {}]   ;;  %s992_s5 = inlined_call_operand.vmem [shape: f32[2,8,1], index: 5, kind: input, shape index: {}]   ;;  %s993_s6 = inlined_call_operand.vmem [shape: bf16[8,256], index: 6, kind: output, shape index: {}]  }
   0x1 LB: > { %s721_s22 = sadd.s32 4294967295, %s778_s21   ;;  %p725_p0 = scmp.ge.s32.totalorder %s778_s21, 1  ;;  %s778_s21 = sphi %s826_s21, %s16_s21  }
   0x2   : > { %p219_p1 = scmp.lt.s32.totalorder %s778_s21, 3 }
   0x4   : > { %p220_p2 = pnand %p725_p0, %p219_p1 }
   0x5   : > { %p250_p3 = scmp.lt.s32.totalorder (!%p220_p2), %s721_s22, 1  ;;  %v780_v0 = vmov (!%p220_p2), 0.0   ;;  %vm781_vm0 = vmmov (!%p220_p2), 0   ;;  %v264_v1 = vld [vmem:[%s990_s3] sm:$0xff] (!%p220_p2)  ;;  %v782_v2 = vmov (!%p220_p2), 0   ;;  %v266_v3 = vld [vmem:[%s990_s3 + $0x10] sm:$0xff] (!%p220_p2) }
   0x6   : > { %223 = sbr.rel (%p220_p2) target bundleno = 637 (0x27d), region = 44  ;;  %738 = vmatprep.subr.bf16.mxu0 (!%p220_p2), %v780_v0  ;;  %740 = vmatprep.mubr.msk.bf16.mxu0 (!%p220_p2), %vm781_vm0, %v780_v0  ;;  %vm307_vm1 = vcmask (!%p220_p2), 1043456   ;;  %v265_v4 = vld [vmem:[%s990_s3 + $0x8] sm:$0xff] (!%p220_p2)  ;;  %v267_v5 = vld [vmem:[%s990_s3 + $0x18] sm:$0xff] (!%p220_p2)  ;;  %v771_v8 = vld [vmem:[%s989_s2] sm:$0xff] (!%p220_p2)   ;;  %vm303_vm2 = vcmask (!%p220_p2), 64512  }
   0x7   : > { %769 = vset.pattern.permute.xlu0 (!%p220_p2), %v782_v2  ;;  %770 = vset.pattern.permute.xlu1 (!%p220_p2), %v782_v2  ;;  %v268_v9 = vld [vmem:[%s990_s3 + $0x20] sm:$0xff] (!%p220_p2)  ;;  %v269_v10 = vld [vmem:[%s990_s3 + $0x28] sm:$0xff] (!%p220_p2)  ;;  %v278_v15 = vld [vmem:[%s990_s3 + $0x70] sm:$0xff] (!%p220_p2)  ;;  %s783_s24 = smov (!%p220_p2), 11   ;;  %s784_s25 = smov (!%p220_p2), 10   ;;  %vm598_vm3 = vcmask (!%p220_p2), 130048  }
   0x8   : > { %354 = vperm.xlu0 (!%p220_p2), %769, %v264_v1   ;;  %366 = vperm.xlu1 (!%p220_p2), %770, %v266_v3   ;;  %v284_v11 = vld [vmem:[%s990_s3 + $0xa0] sm:$0xff] (!%p220_p2)  ;;  %v285_v12 = vld [vmem:[%s990_s3 + $0xa8] sm:$0xff] (!%p220_p2)  ;;  %v279_v16 = vld [vmem:[%s990_s3 + $0x78] sm:$0xff] (!%p220_p2)  ;;  %s785_s26 = smov (!%p220_p2), 9   ;;  %s786_s28 = smov (!%p220_p2), 1  }
   0x9   : > { %744 = vmatprep.subr.bf16.mxu1 (!%p220_p2), %v780_v0  ;;  %746 = vmatprep.mubr.msk.bf16.mxu1 (!%p220_p2), %vm781_vm0, %v780_v0  ;;  %v276_v13 = vld [vmem:[%s990_s3 + $0x60] sm:$0xff] (!%p220_p2)  ;;  %v277_v14 = vld [vmem:[%s990_s3 + $0x68] sm:$0xff] (!%p220_p2)  ;;  %v282_v19 = vld [vmem:[%s990_s3 + $0x90] sm:$0xff] (!%p220_p2)  ;;  %s787_s29 = smov (!%p220_p2), 127   ;;  %s788_s30 = smov (!%p220_p2), 119  }
   0xa   : > { %v280_v17 = vld [vmem:[%s990_s3 + $0x80] sm:$0xff] (!%p220_p2)  ;;  %v281_v18 = vld [vmem:[%s990_s3 + $0x88] sm:$0xff] (!%p220_p2)  ;;  %v283_v20 = vld [vmem:[%s990_s3 + $0x98] sm:$0xff] (!%p220_p2)  ;;  %s789_s7 = smov (!%p220_p2), 118   ;;  %s790_s8 = smov (!%p220_p2), 117  }
   0xb   : > { %v286_v21 = vld [vmem:[%s990_s3 + $0xb0] sm:$0xff] (!%p220_p2)  ;;  %v287_v22 = vld [vmem:[%s990_s3 + $0xb8] sm:$0xff] (!%p220_p2)  ;;  %v288_v23 = vld [vmem:[%s990_s3 + $0xc0] sm:$0xff] (!%p220_p2) }
   0xc   : > { %359 = vperm.xlu0 (!%p220_p2), %769, %v265_v4   ;;  %371 = vperm.xlu1 (!%p220_p2), %770, %v267_v5   ;;  %v289_v24 = vld [vmem:[%s990_s3 + $0xc8] sm:$0xff] (!%p220_p2)  ;;  %v290_v25 = vld [vmem:[%s990_s3 + $0xd0] sm:$0xff] (!%p220_p2)  ;;  %v291_v26 = vld [vmem:[%s990_s3 + $0xd8] sm:$0xff] (!%p220_p2) }
   0xd   : > { %s995_s22 = smov (!%p250_p3, %s721_s22), 1  ;;  %v292_v27 = vld [vmem:[%s990_s3 + $0xe0] sm:$0xff]  ;;  %v293_v28 = vld [vmem:[%s990_s3 + $0xe8] sm:$0xff]  ;;  %v270_v29 = vld [vmem:[%s990_s3 + $0x30] sm:$0xff] }
   0xe   : > { %s726_s27 = sshll.u32 %s995_s22, 2  ;;  %v271_v30 = vld [vmem:[%s990_s3 + $0x38] sm:$0xff]  ;;  %v272_v31 = vld [vmem:[%s990_s3 + $0x40] sm:$0xff]  ;;  %v273_v32 = vld [vmem:[%s990_s3 + $0x48] sm:$0xff]  ;;  %s256_s23 = scalar_lea.vmem %s988_s1, %s995_s22 }
   0xf   : > { %s253_s10 = scalar_lea.vmem %s987_s0, %s726_s27  ;;  %v936_v48 = vld [vmem:[%s256_s23] ss:$0 sm:$0xff]  ;;  %v274_v56 = vld [vmem:[%s990_s3 + $0x50] sm:$0xff]  ;;  %v275_v57 = vld [vmem:[%s990_s3 + $0x58] sm:$0xff]  ;;  %s260_s23 = scalar_lea.vmem %s993_s6, %s726_s27 }
  0x10   : > { %v854_v6 = vld [vmem:[%s253_s10] sm:$0xf]  ;;  %382 = vperm.xlu0 %769, %v268_v9   ;;  %387 = vperm.xlu1 %770, %v269_v10   ;;  %v295_v59 = vld [vmem:[%s992_s5 + $0x8] sm:$0xff] }
  0x11   : > { %v309_v7 = vsel %vm307_vm1, %v854_v6, 0  ;;  %v294_v58 = vld [vmem:[%s992_s5] sm:$0xff] }
  0x12   : > { %739 = vmatpush3.bf16.msra.mxu0 %v309_v7 }
  0x14   : > { %402 = vperm.xlu0 %769, %v284_v11   ;;  %407 = vperm.xlu1 %770, %v285_v12  }
  0x15   : > { %741 = vmatmul.mubr.msk.bf16.vlgmr.msra.gmra.mrb[0].mxu0 %vm303_vm2, %v771_v8 }
  0x18   : > { %418 = vperm.xlu0 %769, %v276_v13   ;;  %423 = vperm.xlu1 %770, %v277_v14  }
  0x1c   : > { %436 = vperm.xlu0 %769, %v278_v15   ;;  %441 = vperm.xlu1 %770, %v279_v16  }
  0x20   : > { %454 = vperm.xlu0 %769, %v280_v17   ;;  %459 = vperm.xlu1 %770, %v281_v18  }
  0x24   : > { %472 = vperm.xlu0 %769, %v282_v19   ;;  %477 = vperm.xlu1 %770, %v283_v20  }
  0x28   : > { %490 = vperm.xlu0 %769, %v286_v21   ;;  %495 = vperm.xlu1 %770, %v287_v22  }
  0x2c   : > { %508 = vperm.xlu0 %769, %v288_v23   ;;  %513 = vperm.xlu1 %770, %v289_v24  }
  0x30   : > { %526 = vperm.xlu0 %769, %v290_v25   ;;  %531 = vperm.xlu1 %770, %v291_v26  }
  0x34   : > { %544 = vperm.xlu0 %769, %v292_v27   ;;  %549 = vperm.xlu1 %770, %v293_v28  }
  0x38   : > { %558 = vperm.xlu0 %769, %v270_v29   ;;  %563 = vperm.xlu1 %770, %v271_v30  }
  0x3c   : > { %570 = vperm.xlu0 %769, %v272_v31   ;;  %575 = vperm.xlu1 %770, %v273_v32  }
  0x87   : > { %v355_v33 = vpop.permute.xlu0 %354  ;;  %v367_v34 = vpop.permute.xlu1 %366 }
  0x8b   : > { %v360_v38 = vpop.permute.xlu0 %359  ;;  %v372_v43 = vpop.permute.xlu1 %371 }
  0x8f   : > { %v383_v49 = vpop.permute.xlu0 %382  ;;  %v388_v52 = vpop.permute.xlu1 %387 }
  0x93   : > { %v403_v60 = vpop.permute.xlu0 %402  ;;  %v408_v61 = vpop.permute.xlu1 %407 }
  0x97   : > { %v419_v62 = vpop.permute.xlu0 %418  ;;  %v424_v63 = vpop.permute.xlu1 %423 }
  0x9b   : > { %v437_v0 = vpop.permute.xlu0 %436  ;;  %v442_v1 = vpop.permute.xlu1 %441 }
  0x9f   : > { %v455_v2 = vpop.permute.xlu0 %454  ;;  %v460_v3 = vpop.permute.xlu1 %459 }
  0xa3   : > { %v473_v4 = vpop.permute.xlu0 %472  ;;  %v478_v5 = vpop.permute.xlu1 %477 }
  0xa7   : > { %v491_v7 = vpop.permute.xlu0 %490  ;;  %v496_v8 = vpop.permute.xlu1 %495 }
  0xab   : > { %v509_v9 = vpop.permute.xlu0 %508  ;;  %v514_v10 = vpop.permute.xlu1 %513 }
  0xaf   : > { %v527_v11 = vpop.permute.xlu0 %526  ;;  %v532_v12 = vpop.permute.xlu1 %531 }
  0xb3   : > { %v545_v13 = vpop.permute.xlu0 %544  ;;  %v550_v14 = vpop.permute.xlu1 %549 }
  0xb7   : > { %v559_v15 = vpop.permute.xlu0 %558  ;;  %v564_v16 = vpop.permute.xlu1 %563 }
  0xbb   : > { %v571_v17 = vpop.permute.xlu0 %570  ;;  %v576_v18 = vpop.permute.xlu1 %575 }
  0xe8   : > { %v345_v35 = vpop.f32.mrb[0].mxu0 }
  0xe9   : > { %v362_v36 = vmul.f32 %v355_v33, %v345_v35  ;;  %v742_v37 = vpop.f32.mrb[1].mxu0 }
  0xea   : > { %v348_v39 = vpop.f32.mrb[2].mxu0 }
  0xeb   : > { %v374_v40 = vadd.f32 %v367_v34, %v362_v36  ;;  %v363_v41 = vmul.f32 %v360_v38, %v348_v39  ;;  %v743_v42 = vpop.f32.mrb[3].mxu0 }
  0xed   : > { %v376_v44 = vmax.f32 %v374_v40, 0.0  ;;  %v375_v45 = vadd.f32 %v372_v43, %v363_v41 }
  0xef   : > { %v378_v46 = vmin.f32 %v376_v44, 6.0  ;;  %v377_v47 = vmax.f32 %v375_v45, 0.0 }
  0xf1   : > { %v390_v50 = vmul.f32 %v383_v49, %v378_v46  ;;  %v379_v51 = vmin.f32 %v377_v47, 6.0 }
  0xf3   : > { %v939_v53 = vmul.f32 %v936_v48, %v390_v50  ;;  %v391_v54 = vmul.f32 %v388_v52, %v379_v51 }
  0xf5   : > { %v942_v55 = vmul.f32 %v936_v48, %v391_v54  ;;  %412 = vrot.lane.b32.xlu0 %v939_v53, %s783_s24  ;;  %v410_v28 = vmul.f32 %v403_v60, %v939_v53 }
  0xf7   : > { %414 = vrot.lane.b32.xlu1 %v942_v55, %s783_s24  ;;  %v411_v33 = vmul.f32 %v408_v61, %v942_v55 }
  0xf9   : > { %430 = vrot.lane.b32.xlu0 %v939_v53, %s784_s25 }
  0xfb   : > { %432 = vrot.lane.b32.xlu1 %v942_v55, %s784_s25 }
  0xfd   : > { %448 = vrot.lane.b32.xlu0 %v939_v53, %s785_s26 }
  0xff   : > { %450 = vrot.lane.b32.xlu1 %v942_v55, %s785_s26 }
 0x101   : > { %466 = vrot.lane.b32.xlu0 %v939_v53, %s786_s28 }
 0x103   : > { %468 = vrot.lane.b32.xlu1 %v942_v55, %s786_s28 }
 0x105   : > { %484 = vrot.lane.b32.xlu0 %v939_v53, %s787_s29 }
 0x107   : > { %486 = vrot.lane.b32.xlu1 %v942_v55, %s787_s29 }
 0x109   : > { %502 = vrot.lane.b32.xlu0 %v939_v53, %s788_s30 }
 0x10b   : > { %504 = vrot.lane.b32.xlu1 %v942_v55, %s788_s30 }
 0x10d   : > { %520 = vrot.lane.b32.xlu0 %v939_v53, %s789_s7 }
 0x10f   : > { %522 = vrot.lane.b32.xlu1 %v942_v55, %s789_s7 }
 0x111   : > { %538 = vrot.lane.b32.xlu0 %v939_v53, %s790_s8 }
 0x113   : > { %540 = vrot.lane.b32.xlu1 %v942_v55, %s790_s8 }
 0x115   : > { %586 = vperm.xlu0 %769, %v274_v56  }
 0x117   : > { %591 = vperm.xlu1 %770, %v275_v57  }
 0x119   : > { %644 = vperm.xlu0 %769, %v294_v58  }
 0x11b   : > { %650 = vperm.xlu1 %770, %v295_v59  }
 0x167   : > { %v413_v19 = vpop.permute.xlu0 %412 }
 0x168   : > { %v426_v26 = vmul.f32 %v419_v62, %v413_v19 }
 0x169   : > { %v415_v20 = vpop.permute.xlu1 %414 }
 0x16a   : > { %v427_v29 = vmul.f32 %v424_v63, %v415_v20  ;;  %v428_v32 = vadd.f32 %v426_v26, %v410_v28 }
 0x16b   : > { %v431_v21 = vpop.permute.xlu0 %430 }
 0x16c   : > { %v444_v30 = vmul.f32 %v437_v0, %v431_v21  ;;  %v429_v37 = vadd.f32 %v427_v29, %v411_v33 }
 0x16d   : > { %v433_v22 = vpop.permute.xlu1 %432 }
 0x16e   : > { %v445_v34 = vmul.f32 %v442_v1, %v433_v22  ;;  %v446_v38 = vadd.f32 %v444_v30, %v428_v32 }
 0x16f   : > { %v449_v23 = vpop.permute.xlu0 %448 }
 0x170   : > { %v462_v35 = vmul.f32 %v455_v2, %v449_v23  ;;  %v447_v42 = vadd.f32 %v445_v34, %v429_v37 }
 0x171   : > { %v451_v24 = vpop.permute.xlu1 %450 }
 0x172   : > { %v463_v39 = vmul.f32 %v460_v3, %v451_v24  ;;  %v464_v43 = vadd.f32 %v462_v35, %v446_v38 }
 0x173   : > { %v467_v25 = vpop.permute.xlu0 %466 }
 0x174   : > { %v480_v40 = vmul.f32 %v473_v4, %v467_v25  ;;  %v465_v47 = vadd.f32 %v463_v39, %v447_v42 }
 0x175   : > { %v469_v27 = vpop.permute.xlu1 %468 }
 0x176   : > { %v481_v44 = vmul.f32 %v478_v5, %v469_v27  ;;  %v482_v49 = vadd.f32 %v480_v40, %v464_v43  ;;  %v655_v27 = vunpack.c.l.bf16 %v854_v6 }
 0x177   : > { %v485_v31 = vpop.permute.xlu0 %484 }
 0x178   : > { %v498_v45 = vmul.f32 %v491_v7, %v485_v31  ;;  %v483_v53 = vadd.f32 %v481_v44, %v465_v47 }
 0x179   : > { %v487_v36 = vpop.permute.xlu1 %486 }
 0x17a   : > { %v499_v50 = vmul.f32 %v496_v8, %v487_v36  ;;  %v500_v54 = vadd.f32 %v498_v45, %v482_v49 }
 0x17b   : > { %v503_v41 = vpop.permute.xlu0 %502 }
 0x17c   : > { %v516_v51 = vmul.f32 %v509_v9, %v503_v41  ;;  %v501_v58 = vadd.f32 %v499_v50, %v483_v53 }
 0x17d   : > { %v505_v46 = vpop.permute.xlu1 %504 }
 0x17e   : > { %v517_v55 = vmul.f32 %v514_v10, %v505_v46  ;;  %v518_v59 = vadd.f32 %v516_v51, %v500_v54 }
 0x17f   : > { %v521_v52 = vpop.permute.xlu0 %520 }
 0x180   : > { %v534_v56 = vmul.f32 %v527_v11, %v521_v52  ;;  %v519_v62 = vadd.f32 %v517_v55, %v501_v58 }
 0x181   : > { %v523_v57 = vpop.permute.xlu1 %522 }
 0x182   : > { %v535_v60 = vmul.f32 %v532_v12, %v523_v57  ;;  %v536_v63 = vadd.f32 %v534_v56, %v518_v59 }
 0x183   : > { %v539_v61 = vpop.permute.xlu0 %538 }
 0x184   : > { %v552_v0 = vmul.f32 %v545_v13, %v539_v61  ;;  %v537_v2 = vadd.f32 %v535_v60, %v519_v62  ;;  %v596_v13 = vld [vmem:[%s991_s4] sm:$0xf] }
 0x185   : > { %v541_v1 = vpop.permute.xlu1 %540 }
 0x186   : > { %v554_v3 = vadd.f32 %v552_v0, %v536_v63  ;;  %v553_v4 = vmul.f32 %v550_v14, %v541_v1 }
 0x188   : > { %v555_v5 = vadd.f32 %v553_v4, %v537_v2  ;;  %v566_v7 = vmul.f32 %v559_v15, %v554_v3 }
 0x18a   : > { %v567_v8 = vmul.f32 %v564_v16, %v555_v5  ;;  %v578_v9 = vadd.f32 %v571_v17, %v566_v7 }
 0x18c   : > { %v579_v19 = vadd.f32 %v576_v18, %v567_v8  ;;  %v580_v20 = vmax.f32 %v578_v9, 0.0 }
 0x18e   : > { %v581_v10 = vmax.f32 %v579_v19, 0.0  ;;  %v582_v21 = vmin.f32 %v580_v20, 6.0 }
 0x190   : > { %v583_v22 = vmin.f32 %v581_v10, 6.0 }
 0x194   : > { %v587_v11 = vpop.permute.xlu0 %586 }
 0x195   : > { %v594_v12 = vmul.f32 %v587_v11, %v582_v21 }
 0x196   : > { %v592_v23 = vpop.permute.xlu1 %591 }
 0x197   : > { %v595_v24 = vmul.f32 %v592_v23, %v583_v22 }
 0x198   : > { %v645_v14 = vpop.permute.xlu0 %644 }
 0x199   : > { %v597_v25 = vpack.c.bf16 %v595_v24, %v594_v12 }
 0x19a   : > { %v651_v18 = vpop.permute.xlu1 %650 }
 0x19b   : > { %745 = vmatpush3.bf16.msra.mxu1 %v597_v25 }
 0x19e   : > { %747 = vmatmul.mubr.msk.bf16.vlgmr.msra.gmra.mrb[0].mxu1 %vm598_vm3, %v596_v13 }
 0x271   : > { %v636_v15 = vpop.f32.mrb[0].mxu1 }
 0x272   : > { %v647_v16 = vmul.f32 %v645_v14, %v636_v15  ;;  %v748_v17 = vpop.f32.mrb[1].mxu1 }
 0x273   : > { %v639_v26 = vpop.f32.mrb[2].mxu1 }
 0x274   : > { %v653_v28 = vadd.f32 %v651_v18, %v647_v16  ;;  %v749_v29 = vpop.f32.mrb[3].mxu1 }
 0x276   : > { %v654_v30 = vmul.f32 %v936_v48, %v653_v28 }
 0x278   : > { %v656_v31 = vadd.f32 %v655_v27, %v654_v30 }
 0x27a   : > { %v657_v32 = vpack.c.bf16 %v656_v31, %v656_v31 }
 0x27c   : > { %658 = vst [vmem:[%s260_s23] sm:$0xf] %v657_v32 }
 0x27d PF: > { %s16_s21 = sadd.s32 1, %s778_s21  }
 0x27e   : > { %p13_p4 = scmp.ge.s32.totalorder %s16_s21, 4  }
 0x280   :  { %15 = sbr.rel (!%p13_p4) target bundleno = 1 (0x1), region = 77 }

</bundles_post_ra>
